<compile_context>
chip_gen: v7x
topology: tpu7x:2x2x1
jax: 0.10.0
libtpu: 0.0.40
codegen_flags: <defaults>
</compile_context>

<pallas_src>
import functools

import jax
import jax.numpy as jnp
from jax import lax
from jax.experimental import pallas as pl
from jax.experimental.pallas import tpu as pltpu


# ----------------------------------------------------------------------------
# Hardware / tiling helpers
# ----------------------------------------------------------------------------
def _tpu_vmem_bytes():
    try:
        return int(pltpu.get_tpu_info().vmem_capacity_bytes)
    except Exception:
        return 64 * 1024 * 1024          # conservative (v7x) default


def _choose_rows(ho, wo, n, fixed_bytes, per_row_bytes, budget):
    """Output rows per tile: a divisor of ho (no masked last tile), tile
    second-minor dim a multiple of 8 (or the full dim), fits the VMEM budget,
    and prefers >= 4 total grid steps so both v7x TensorCores get work."""
    valid = []
    for d in range(1, ho + 1):
        if ho % d:
            continue
        if (d * wo) % 8 and d != ho:
            continue
        if fixed_bytes + per_row_bytes * d <= budget:
            valid.append(d)
    if not valid:
        return ho
    pref = [d for d in valid if n * (ho // d) >= 4]
    return max(pref) if pref else max(valid)


# ----------------------------------------------------------------------------
# Pallas kernel: 9 in-kernel taps -> 9 MXU dots into an f32 accumulator,
# + folded-BN shift, + optional fused 1x1 projection shortcut or identity
# residual, + optional ReLU.
# ----------------------------------------------------------------------------
def _conv_bn_kernel(*refs, stride, ht, tr, wo, cin, apply_relu, res_mode):
    if res_mode == "proj":
        xt_ref, w_ref, shift_ref, xs_ref, scw_ref, out_ref = refs
    elif res_mode == "add":
        xt_ref, w_ref, shift_ref, res_ref, out_ref = refs
    else:
        xt_ref, w_ref, shift_ref, out_ref = refs

    j = pl.program_id(1)
    row0 = j * tr                    # output-row start == transformed-row start
    tp = tr * wo
    cout = w_ref.shape[-1]

    acc = jnp.zeros((tp, cout), jnp.float32)
    # 9 taps formed as plain contiguous slices of the resident image block
    # (the stride-2 case was turned into stride-1 via space-to-depth on host).
    for kh in range(3):
        for kw in range(3):
            t = kh * 3 + kw
            phase = (kh % stride) * stride + (kw % stride)
            base = phase * ht + row0 + (kh // stride)
            tap = xt_ref[pl.ds(base, tr), pl.ds(kw // stride, wo), :]
            acc = acc + jnp.dot(tap.reshape(tp, cin), w_ref[t],
                                preferred_element_type=jnp.float32)

    y = acc + shift_ref[...]                      # f32 epilogue (v5e-friendly)

    if res_mode == "proj":
        # fused 1x1 projection shortcut (its BN shift is folded into shift_ref)
        y = y + jnp.dot(xs_ref[...], scw_ref[...],
                        preferred_element_type=jnp.float32)
    elif res_mode == "add":
        y = y + res_ref[...].astype(jnp.float32)  # bf16 identity residual

    if apply_relu:
        y = jnp.maximum(y, 0.0)

    out_ref[...] = y.astype(out_ref.dtype)


def conv_bn_pallas(xt, w, shift, *, stride, ho, wo, apply_relu, out_dtype,
                   sc_x=None, sc_w=None, residual=None):
    """xt: transformed padded input (N, phases*Ht, Wt, Cin) bf16;
    w: (9, Cin, Cout) bf16 (BN scale folded); shift: (1, Cout) f32;
    sc_x: (N, P, Cx) bf16 strided input of the 1x1 projection (sc_w (Cx, Cout));
    residual: (N, P, Cout) bf16 identity shortcut.
    Returns (N, P, Cout) in out_dtype, P = ho*wo."""
    n, rows_t, wt, cin = xt.shape
    nph = stride * stride
    ht = rows_t // nph
    kk, _, cout = w.shape
    p = ho * wo
    out_isize = jnp.dtype(out_dtype).itemsize

    # ---- generation-aware VMEM budget (grid-invariant blocks included) ----
    cap = _tpu_vmem_bytes()
    vmem_base = min(cap * 3 // 4, 96 * 1024 * 1024)
    budget = vmem_base - (8 << 20)
    # grid-invariant blocks (image, weight, shift[, sc weight]) x2 buffers.
    # (pipeline_mode=pl.Buffered(1) would halve this; kept at 2 for safety and
    #  accounted for explicitly instead.)
    fixed = (2 * rows_t * wt * cin * xt.dtype.itemsize
             + 2 * w.size * w.dtype.itemsize
             + 2 * shift.size * shift.dtype.itemsize)
    if sc_w is not None:
        fixed += 2 * sc_w.size * sc_w.dtype.itemsize
    # per-output-image-row bytes of the spatially tiled blocks (x2 buffers)
    per_row = 2 * wo * cout * out_isize
    if sc_x is not None:
        per_row += 2 * wo * sc_x.shape[-1] * sc_x.dtype.itemsize
    if residual is not None:
        per_row += 2 * wo * residual.shape[-1] * residual.dtype.itemsize

    tr = _choose_rows(ho, wo, n, fixed, per_row, budget)
    tp = tr * wo
    grid = (n, ho // tr)
    vmem_limit = min(cap * 9 // 10,
                     max(vmem_base, fixed + per_row * tr + (8 << 20)))

    in_specs = [
        # full transformed image per sample; index constant over j -> fetched
        # once per sample (no re-DMA), taps formed in-kernel from it.
        pl.BlockSpec((pl.Squeezed(), rows_t, wt, cin),
                     lambda i, j: (i, 0, 0, 0)),
        pl.BlockSpec((kk, cin, cout), lambda i, j: (0, 0, 0)),
        pl.BlockSpec((1, cout), lambda i, j: (0, 0)),
    ]
    args = [xt, w, shift]

    flops = 2 * n * p * (kk * cin) * cout
    bytes_acc = (xt.size * xt.dtype.itemsize + w.size * w.dtype.itemsize
                 + shift.size * shift.dtype.itemsize
                 + n * p * cout * out_isize)

    res_mode = "none"
    if sc_x is not None:
        res_mode = "proj"
        cx = sc_x.shape[-1]
        in_specs += [
            pl.BlockSpec((pl.Squeezed(), tp, cx), lambda i, j: (i, j, 0)),
            pl.BlockSpec((cx, cout), lambda i, j: (0, 0)),
        ]
        args += [sc_x, sc_w]
        flops += 2 * n * p * cx * cout
        bytes_acc += (sc_x.size * sc_x.dtype.itemsize
                      + sc_w.size * sc_w.dtype.itemsize)
    elif residual is not None:
        res_mode = "add"
        in_specs.append(
            pl.BlockSpec((pl.Squeezed(), tp, cout), lambda i, j: (i, j, 0)))
        args.append(residual)
        bytes_acc += residual.size * residual.dtype.itemsize

    kernel = functools.partial(
        _conv_bn_kernel, stride=stride, ht=ht, tr=tr, wo=wo, cin=cin,
        apply_relu=apply_relu, res_mode=res_mode)

    return pl.pallas_call(
        kernel,
        out_shape=jax.ShapeDtypeStruct((n, p, cout), out_dtype),
        grid=grid,
        in_specs=in_specs,
        out_specs=pl.BlockSpec((pl.Squeezed(), tp, cout),
                               lambda i, j: (i, j, 0)),
        compiler_params=pltpu.CompilerParams(
            dimension_semantics=("parallel", "parallel"),
            vmem_limit_bytes=int(vmem_limit)),
        cost_estimate=pl.CostEstimate(
            flops=flops, transcendentals=0, bytes_accessed=bytes_acc),
    )(*args)


# ----------------------------------------------------------------------------
# Plain-JAX glue: input transform (pad / space-to-depth), weight & BN prep
# ----------------------------------------------------------------------------
def transform_input(x_nhwc, stride, dtype=jnp.bfloat16):
    """Pads by 1 and, for stride 2, space-to-depth transforms so that the
    kernel only needs stride-1 slices.  Returns (N, phases*Ht, Wt, C), ho, wo."""
    assert stride in (1, 2), "ResNet BasicBlock only uses stride 1 or 2"
    n, h, w, c = x_nhwc.shape
    ho = (h + 2 - 3) // stride + 1
    wo = (w + 2 - 3) // stride + 1
    xp = jnp.pad(x_nhwc.astype(dtype), ((0, 0), (1, 1), (1, 1), (0, 0)))
    if stride == 1:
        return xp, ho, wo                              # (N, ho+2, wo+2, C)
    ht, wt = ho + 1, wo + 1
    xp = jnp.pad(xp, ((0, 0), (0, 2 * ht - (h + 2)),
                      (0, 2 * wt - (w + 2)), (0, 0)))
    phases = [xp[:, pr::2, pc::2, :] for pr in (0, 1) for pc in (0, 1)]
    return jnp.concatenate(phases, axis=1), ho, wo     # (N, 4*ht, wt, C)


def fold_bn(gamma, beta, running_mean, running_var, eps=1e-5):
    scale = gamma / jnp.sqrt(running_var + eps)
    shift = beta - running_mean * scale
    return scale, shift


def prep_weight3x3(w_oihw, scale, shift_vec, dtype=jnp.bfloat16):
    """(Cout,Cin,3,3) -> (9, Cin, Cout) bf16 with BN scale folded, (1,Cout) f32 shift."""
    cout, cin, kh, kw = w_oihw.shape
    wm = jnp.transpose(w_oihw, (2, 3, 1, 0)).reshape(kh * kw, cin, cout)
    wm = (wm * scale[None, None, :]).astype(dtype)
    sh = shift_vec.reshape(1, cout).astype(jnp.float32)
    return wm, sh


def prep_weight1x1(w_oihw, scale, shift_vec, dtype=jnp.bfloat16):
    """(Cout,Cin,1,1) -> (Cin, Cout) bf16 with BN scale folded, (1,Cout) f32 shift."""
    cout, cin = w_oihw.shape[0], w_oihw.shape[1]
    wm = (jnp.transpose(w_oihw.reshape(cout, cin), (1, 0))
          * scale[None, :]).astype(dtype)
    sh = shift_vec.reshape(1, cout).astype(jnp.float32)
    return wm, sh


# ----------------------------------------------------------------------------
# BasicBlock forward (Pallas)
# ----------------------------------------------------------------------------
def basic_block_forward(x_nchw, params, stride):
    # TODO(synk): when chaining blocks, keep NHWC (and bf16) between blocks and
    #             drop these per-block transposes.
    x = jnp.transpose(x_nchw, (0, 2, 3, 1)).astype(jnp.float32)   # NHWC
    n, h, w, cin = x.shape
    planes = params["w1"].shape[0]

    # ---- conv1 + bn1 + relu (bf16 output: only feeds conv2's taps) ----
    s1, b1 = fold_bn(*params["bn1"])
    w1, sh1 = prep_weight3x3(params["w1"], s1, b1)
    xt1, ho, wo = transform_input(x, stride)
    p = ho * wo
    out1 = conv_bn_pallas(xt1, w1, sh1, stride=stride, ho=ho, wo=wo,
                          apply_relu=True, out_dtype=jnp.bfloat16)  # (N,P,planes)

    # ---- conv2 + bn2 + shortcut + relu (single fused kernel) ----
    s2, b2 = fold_bn(*params["bn2"])
    w2, sh2 = prep_weight3x3(params["w2"], s2, b2)
    out1_img = out1.reshape(n, ho, wo, planes)
    xt2, _, _ = transform_input(out1_img, 1)

    if stride != 1 or cin != planes:
        # projection shortcut fused into the conv2 kernel; its BN shift folded
        # into the main shift on the host.
        ssc, bsc = fold_bn(*params["bnsc"])
        wsc, shsc = prep_weight1x1(params["wsc"], ssc, bsc)
        xs = x[:, ::stride, ::stride, :].reshape(n, p, cin).astype(jnp.bfloat16)
        out2 = conv_bn_pallas(xt2, w2, sh2 + shsc, stride=1, ho=ho, wo=wo,
                              apply_relu=True, out_dtype=jnp.float32,
                              sc_x=xs, sc_w=wsc)
    else:
        # identity shortcut (stride==1 and cin==planes), passed in bf16
        res = x.reshape(n, p, planes).astype(jnp.bfloat16)
        out2 = conv_bn_pallas(xt2, w2, sh2, stride=1, ho=ho, wo=wo,
                              apply_relu=True, out_dtype=jnp.float32,
                              residual=res)

    out = out2.reshape(n, ho, wo, planes)
    return jnp.transpose(out, (0, 3, 1, 2))   # back to NCHW


# ----------------------------------------------------------------------------
# Pure-JAX reference (NCHW, f32 lax conv) for correctness checking
# ----------------------------------------------------------------------------
def _ref_conv(x, w, stride, pad):
    return lax.conv_general_dilated(
        x, w, window_strides=(stride, stride),
        padding=((pad, pad), (pad, pad)),
        dimension_numbers=("NCHW", "OIHW", "NCHW"))


def _ref_bn(x, bn, eps=1e-5):
    gamma, beta, mean, var = bn
    scale = (gamma / jnp.sqrt(var + eps)).reshape(1, -1, 1, 1)
    shift = (beta - mean * gamma / jnp.sqrt(var + eps)).reshape(1, -1, 1, 1)
    return x * scale + shift


def basic_block_ref(x, params, stride):
    cin = x.shape[1]
    planes = params["w1"].shape[0]
    out = jax.nn.relu(_ref_bn(_ref_conv(x, params["w1"], stride, 1), params["bn1"]))
    out = _ref_bn(_ref_conv(out, params["w2"], 1, 1), params["bn2"])
    if stride != 1 or cin != planes:
        sc = _ref_bn(_ref_conv(x, params["wsc"], stride, 0), params["bnsc"])
    else:
        sc = x
    return jax.nn.relu(out + sc)


# ----------------------------------------------------------------------------
# Deterministic parameter construction
# ----------------------------------------------------------------------------
def make_params(key, in_planes, planes, stride):
    ks = jax.random.split(key, 12)

    def bn_params(k, c):
        k1, k2, k3, k4 = jax.random.split(k, 4)
        gamma = 1.0 + 0.1 * jax.random.normal(k1, (c,), jnp.float32)
        beta = 0.1 * jax.random.normal(k2, (c,), jnp.float32)
        mean = 0.1 * jax.random.normal(k3, (c,), jnp.float32)
        var = 1.0 + 0.5 * jax.random.uniform(k4, (c,), jnp.float32)
        return (gamma, beta, mean, var)

    params = {
        "w1": 0.1 * jax.random.normal(ks[0], (planes, in_planes, 3, 3), jnp.float32),
        "bn1": bn_params(ks[1], planes),
        "w2": 0.1 * jax.random.normal(ks[2], (planes, planes, 3, 3), jnp.float32),
        "bn2": bn_params(ks[3], planes),
    }
    if stride != 1 or in_planes != planes:
        params["wsc"] = 0.1 * jax.random.normal(
            ks[4], (planes, in_planes, 1, 1), jnp.float32)
        params["bnsc"] = bn_params(ks[5], planes)
    return params


if __name__ == "__main__":
    key = jax.random.PRNGKey(0)
    kx, kp1, kp2, kp3 = jax.random.split(key, 4)

    configs = [
        # (in_planes, planes, stride)
        (4, 8, 1),   # projection shortcut (channel change)
        (4, 8, 2),   # projection shortcut (stride + channel change)
        (8, 8, 1),   # identity shortcut
    ]
    pkeys = [kp1, kp2, kp3]

    for (in_planes, planes, stride), pkey in zip(configs, pkeys):
        x = jax.random.normal(kx, (2, in_planes, 16, 16), jnp.float32)
        params = make_params(pkey, in_planes, planes, stride)

        out = basic_block_forward(x, params, stride)
        out = jax.block_until_ready(out)

        ref = basic_block_ref(x, params, stride)
        assert out.shape == ref.shape, (out.shape, ref.shape)
        # bf16 matmul operands / bf16 intermediates (f32 accumulate) -> loosened tolerance.
        err = float(jnp.max(jnp.abs(out - ref)))
        denom = float(jnp.max(jnp.abs(ref))) + 1e-6
        assert err <= 3e-2 * denom + 1e-3, (
            f"mismatch for config {(in_planes, planes, stride)}: "
            f"max err {err}, max |ref| {denom}")

    print("KERNEL_OK")
</pallas_src>

<mosaic_0001>
module attributes {stable_mosaic.version = 11 : i64} {
  func.func @_conv_bn_kernel(%arg0: i32, %arg1: i32, %arg2: memref<1x18x18x4xbf16, #tpu.memory_space<vmem>>, %arg3: memref<9x4x8xbf16, #tpu.memory_space<vmem>>, %arg4: memref<1x8xf32, #tpu.memory_space<vmem>>, %arg5: memref<1x128x8xbf16, #tpu.memory_space<vmem>>) attributes {dimension_semantics = [#tpu.dimension_semantics<parallel>, #tpu.dimension_semantics<parallel>], iteration_bounds = array<i64: 2, 2>, scalar_prefetch = 0 : i64, scratch_operands = 0 : i64, tpu.core_type = #tpu.core_type<tc>, window_params = [{transform_indices = @transform_0, window_bounds = array<i64: 1, 18, 18, 4>}, {pipeline_mode = #tpu.pipeline_mode<synchronous>, transform_indices = @transform_1, window_bounds = array<i64: 9, 4, 8>}, {pipeline_mode = #tpu.pipeline_mode<synchronous>, transform_indices = @transform_2, window_bounds = array<i64: 1, 8>}, {transform_indices = @transform_3, window_bounds = array<i64: 1, 128, 8>}]} {
    %c8_i32 = arith.constant 8 : i32
    %0 = arith.muli %arg1, %c8_i32 : i32
    %cst = arith.constant 0.000000e+00 : f32
    %1 = vector.broadcast %cst : f32 to vector<128x8xf32>
    %c0_i32 = arith.constant 0 : i32
    %2 = arith.addi %c0_i32, %0 : i32
    %c0_i32_0 = arith.constant 0 : i32
    %3 = arith.addi %2, %c0_i32_0 : i32
    %c0 = arith.constant 0 : index
    %4 = arith.index_cast %3 : i32 to index
    %c0_1 = arith.constant 0 : index
    %c0_2 = arith.constant 0 : index
    %5 = vector.load %arg2[%c0, %4, %c0_1, %c0_2] : memref<1x18x18x4xbf16, #tpu.memory_space<vmem>>, vector<1x8x16x4xbf16>
    %6 = vector.shape_cast %5 : vector<1x8x16x4xbf16> to vector<8x16x4xbf16>
    %7 = vector.shape_cast %6 : vector<8x16x4xbf16> to vector<128x4xbf16>
    %c0_3 = arith.constant 0 : index
    %c0_4 = arith.constant 0 : index
    %c0_5 = arith.constant 0 : index
    %8 = vector.load %arg3[%c0_3, %c0_4, %c0_5] : memref<9x4x8xbf16, #tpu.memory_space<vmem>>, vector<1x4x8xbf16>
    %9 = vector.shape_cast %8 : vector<1x4x8xbf16> to vector<4x8xbf16>
    %cst_6 = arith.constant dense<0.000000e+00> : vector<128x8xf32>
    %10 = tpu.matmul %7, %9, %cst_6 {dimension_numbers = #tpu.dot_dimension_numbers<[1], [0], [0], [1], [0, 0, 1, 1], [], []>} : vector<128x4xbf16>, vector<4x8xbf16>, vector<128x8xf32> -> vector<128x8xf32>
    %11 = arith.addf %1, %10 : vector<128x8xf32>
    %c0_i32_7 = arith.constant 0 : i32
    %12 = arith.addi %c0_i32_7, %0 : i32
    %c0_i32_8 = arith.constant 0 : i32
    %13 = arith.addi %12, %c0_i32_8 : i32
    %c0_9 = arith.constant 0 : index
    %14 = arith.index_cast %13 : i32 to index
    %c1 = arith.constant 1 : index
    %c0_10 = arith.constant 0 : index
    %15 = vector.load %arg2[%c0_9, %14, %c1, %c0_10] : memref<1x18x18x4xbf16, #tpu.memory_space<vmem>>, vector<1x8x16x4xbf16>
    %16 = vector.shape_cast %15 : vector<1x8x16x4xbf16> to vector<8x16x4xbf16>
    %17 = vector.shape_cast %16 : vector<8x16x4xbf16> to vector<128x4xbf16>
    %c1_11 = arith.constant 1 : index
    %c0_12 = arith.constant 0 : index
    %c0_13 = arith.constant 0 : index
    %18 = vector.load %arg3[%c1_11, %c0_12, %c0_13] : memref<9x4x8xbf16, #tpu.memory_space<vmem>>, vector<1x4x8xbf16>
    %19 = vector.shape_cast %18 : vector<1x4x8xbf16> to vector<4x8xbf16>
    %cst_14 = arith.constant dense<0.000000e+00> : vector<128x8xf32>
    %20 = tpu.matmul %17, %19, %cst_14 {dimension_numbers = #tpu.dot_dimension_numbers<[1], [0], [0], [1], [0, 0, 1, 1], [], []>} : vector<128x4xbf16>, vector<4x8xbf16>, vector<128x8xf32> -> vector<128x8xf32>
    %21 = arith.addf %11, %20 : vector<128x8xf32>
    %c0_i32_15 = arith.constant 0 : i32
    %22 = arith.addi %c0_i32_15, %0 : i32
    %c0_i32_16 = arith.constant 0 : i32
    %23 = arith.addi %22, %c0_i32_16 : i32
    %c0_17 = arith.constant 0 : index
    %24 = arith.index_cast %23 : i32 to index
    %c2 = arith.constant 2 : index
    %c0_18 = arith.constant 0 : index
    %25 = vector.load %arg2[%c0_17, %24, %c2, %c0_18] : memref<1x18x18x4xbf16, #tpu.memory_space<vmem>>, vector<1x8x16x4xbf16>
    %26 = vector.shape_cast %25 : vector<1x8x16x4xbf16> to vector<8x16x4xbf16>
    %27 = vector.shape_cast %26 : vector<8x16x4xbf16> to vector<128x4xbf16>
    %c2_19 = arith.constant 2 : index
    %c0_20 = arith.constant 0 : index
    %c0_21 = arith.constant 0 : index
    %28 = vector.load %arg3[%c2_19, %c0_20, %c0_21] : memref<9x4x8xbf16, #tpu.memory_space<vmem>>, vector<1x4x8xbf16>
    %29 = vector.shape_cast %28 : vector<1x4x8xbf16> to vector<4x8xbf16>
    %cst_22 = arith.constant dense<0.000000e+00> : vector<128x8xf32>
    %30 = tpu.matmul %27, %29, %cst_22 {dimension_numbers = #tpu.dot_dimension_numbers<[1], [0], [0], [1], [0, 0, 1, 1], [], []>} : vector<128x4xbf16>, vector<4x8xbf16>, vector<128x8xf32> -> vector<128x8xf32>
    %31 = arith.addf %21, %30 : vector<128x8xf32>
    %c0_i32_23 = arith.constant 0 : i32
    %32 = arith.addi %c0_i32_23, %0 : i32
    %c1_i32 = arith.constant 1 : i32
    %33 = arith.addi %32, %c1_i32 : i32
    %c0_24 = arith.constant 0 : index
    %34 = arith.index_cast %33 : i32 to index
    %c0_25 = arith.constant 0 : index
    %c0_26 = arith.constant 0 : index
    %35 = vector.load %arg2[%c0_24, %34, %c0_25, %c0_26] : memref<1x18x18x4xbf16, #tpu.memory_space<vmem>>, vector<1x8x16x4xbf16>
    %36 = vector.shape_cast %35 : vector<1x8x16x4xbf16> to vector<8x16x4xbf16>
    %37 = vector.shape_cast %36 : vector<8x16x4xbf16> to vector<128x4xbf16>
    %c3 = arith.constant 3 : index
    %c0_27 = arith.constant 0 : index
    %c0_28 = arith.constant 0 : index
    %38 = vector.load %arg3[%c3, %c0_27, %c0_28] : memref<9x4x8xbf16, #tpu.memory_space<vmem>>, vector<1x4x8xbf16>
    %39 = vector.shape_cast %38 : vector<1x4x8xbf16> to vector<4x8xbf16>
    %cst_29 = arith.constant dense<0.000000e+00> : vector<128x8xf32>
    %40 = tpu.matmul %37, %39, %cst_29 {dimension_numbers = #tpu.dot_dimension_numbers<[1], [0], [0], [1], [0, 0, 1, 1], [], []>} : vector<128x4xbf16>, vector<4x8xbf16>, vector<128x8xf32> -> vector<128x8xf32>
    %41 = arith.addf %31, %40 : vector<128x8xf32>
    %c0_i32_30 = arith.constant 0 : i32
    %42 = arith.addi %c0_i32_30, %0 : i32
    %c1_i32_31 = arith.constant 1 : i32
    %43 = arith.addi %42, %c1_i32_31 : i32
    %c0_32 = arith.constant 0 : index
    %44 = arith.index_cast %43 : i32 to index
    %c1_33 = arith.constant 1 : index
    %c0_34 = arith.constant 0 : index
    %45 = vector.load %arg2[%c0_32, %44, %c1_33, %c0_34] : memref<1x18x18x4xbf16, #tpu.memory_space<vmem>>, vector<1x8x16x4xbf16>
    %46 = vector.shape_cast %45 : vector<1x8x16x4xbf16> to vector<8x16x4xbf16>
    %47 = vector.shape_cast %46 : vector<8x16x4xbf16> to vector<128x4xbf16>
    %c4 = arith.constant 4 : index
    %c0_35 = arith.constant 0 : index
    %c0_36 = arith.constant 0 : index
    %48 = vector.load %arg3[%c4, %c0_35, %c0_36] : memref<9x4x8xbf16, #tpu.memory_space<vmem>>, vector<1x4x8xbf16>
    %49 = vector.shape_cast %48 : vector<1x4x8xbf16> to vector<4x8xbf16>
    %cst_37 = arith.constant dense<0.000000e+00> : vector<128x8xf32>
    %50 = tpu.matmul %47, %49, %cst_37 {dimension_numbers = #tpu.dot_dimension_numbers<[1], [0], [0], [1], [0, 0, 1, 1], [], []>} : vector<128x4xbf16>, vector<4x8xbf16>, vector<128x8xf32> -> vector<128x8xf32>
    %51 = arith.addf %41, %50 : vector<128x8xf32>
    %c0_i32_38 = arith.constant 0 : i32
    %52 = arith.addi %c0_i32_38, %0 : i32
    %c1_i32_39 = arith.constant 1 : i32
    %53 = arith.addi %52, %c1_i32_39 : i32
    %c0_40 = arith.constant 0 : index
    %54 = arith.index_cast %53 : i32 to index
    %c2_41 = arith.constant 2 : index
    %c0_42 = arith.constant 0 : index
    %55 = vector.load %arg2[%c0_40, %54, %c2_41, %c0_42] : memref<1x18x18x4xbf16, #tpu.memory_space<vmem>>, vector<1x8x16x4xbf16>
    %56 = vector.shape_cast %55 : vector<1x8x16x4xbf16> to vector<8x16x4xbf16>
    %57 = vector.shape_cast %56 : vector<8x16x4xbf16> to vector<128x4xbf16>
    %c5 = arith.constant 5 : index
    %c0_43 = arith.constant 0 : index
    %c0_44 = arith.constant 0 : index
    %58 = vector.load %arg3[%c5, %c0_43, %c0_44] : memref<9x4x8xbf16, #tpu.memory_space<vmem>>, vector<1x4x8xbf16>
    %59 = vector.shape_cast %58 : vector<1x4x8xbf16> to vector<4x8xbf16>
    %cst_45 = arith.constant dense<0.000000e+00> : vector<128x8xf32>
    %60 = tpu.matmul %57, %59, %cst_45 {dimension_numbers = #tpu.dot_dimension_numbers<[1], [0], [0], [1], [0, 0, 1, 1], [], []>} : vector<128x4xbf16>, vector<4x8xbf16>, vector<128x8xf32> -> vector<128x8xf32>
    %61 = arith.addf %51, %60 : vector<128x8xf32>
    %c0_i32_46 = arith.constant 0 : i32
    %62 = arith.addi %c0_i32_46, %0 : i32
    %c2_i32 = arith.constant 2 : i32
    %63 = arith.addi %62, %c2_i32 : i32
    %c0_47 = arith.constant 0 : index
    %64 = arith.index_cast %63 : i32 to index
    %c0_48 = arith.constant 0 : index
    %c0_49 = arith.constant 0 : index
    %65 = vector.load %arg2[%c0_47, %64, %c0_48, %c0_49] : memref<1x18x18x4xbf16, #tpu.memory_space<vmem>>, vector<1x8x16x4xbf16>
    %66 = vector.shape_cast %65 : vector<1x8x16x4xbf16> to vector<8x16x4xbf16>
    %67 = vector.shape_cast %66 : vector<8x16x4xbf16> to vector<128x4xbf16>
    %c6 = arith.constant 6 : index
    %c0_50 = arith.constant 0 : index
    %c0_51 = arith.constant 0 : index
    %68 = vector.load %arg3[%c6, %c0_50, %c0_51] : memref<9x4x8xbf16, #tpu.memory_space<vmem>>, vector<1x4x8xbf16>
    %69 = vector.shape_cast %68 : vector<1x4x8xbf16> to vector<4x8xbf16>
    %cst_52 = arith.constant dense<0.000000e+00> : vector<128x8xf32>
    %70 = tpu.matmul %67, %69, %cst_52 {dimension_numbers = #tpu.dot_dimension_numbers<[1], [0], [0], [1], [0, 0, 1, 1], [], []>} : vector<128x4xbf16>, vector<4x8xbf16>, vector<128x8xf32> -> vector<128x8xf32>
    %71 = arith.addf %61, %70 : vector<128x8xf32>
    %c0_i32_53 = arith.constant 0 : i32
    %72 = arith.addi %c0_i32_53, %0 : i32
    %c2_i32_54 = arith.constant 2 : i32
    %73 = arith.addi %72, %c2_i32_54 : i32
    %c0_55 = arith.constant 0 : index
    %74 = arith.index_cast %73 : i32 to index
    %c1_56 = arith.constant 1 : index
    %c0_57 = arith.constant 0 : index
    %75 = vector.load %arg2[%c0_55, %74, %c1_56, %c0_57] : memref<1x18x18x4xbf16, #tpu.memory_space<vmem>>, vector<1x8x16x4xbf16>
    %76 = vector.shape_cast %75 : vector<1x8x16x4xbf16> to vector<8x16x4xbf16>
    %77 = vector.shape_cast %76 : vector<8x16x4xbf16> to vector<128x4xbf16>
    %c7 = arith.constant 7 : index
    %c0_58 = arith.constant 0 : index
    %c0_59 = arith.constant 0 : index
    %78 = vector.load %arg3[%c7, %c0_58, %c0_59] : memref<9x4x8xbf16, #tpu.memory_space<vmem>>, vector<1x4x8xbf16>
    %79 = vector.shape_cast %78 : vector<1x4x8xbf16> to vector<4x8xbf16>
    %cst_60 = arith.constant dense<0.000000e+00> : vector<128x8xf32>
    %80 = tpu.matmul %77, %79, %cst_60 {dimension_numbers = #tpu.dot_dimension_numbers<[1], [0], [0], [1], [0, 0, 1, 1], [], []>} : vector<128x4xbf16>, vector<4x8xbf16>, vector<128x8xf32> -> vector<128x8xf32>
    %81 = arith.addf %71, %80 : vector<128x8xf32>
    %c0_i32_61 = arith.constant 0 : i32
    %82 = arith.addi %c0_i32_61, %0 : i32
    %c2_i32_62 = arith.constant 2 : i32
    %83 = arith.addi %82, %c2_i32_62 : i32
    %c0_63 = arith.constant 0 : index
    %84 = arith.index_cast %83 : i32 to index
    %c2_64 = arith.constant 2 : index
    %c0_65 = arith.constant 0 : index
    %85 = vector.load %arg2[%c0_63, %84, %c2_64, %c0_65] : memref<1x18x18x4xbf16, #tpu.memory_space<vmem>>, vector<1x8x16x4xbf16>
    %86 = vector.shape_cast %85 : vector<1x8x16x4xbf16> to vector<8x16x4xbf16>
    %87 = vector.shape_cast %86 : vector<8x16x4xbf16> to vector<128x4xbf16>
    %c8 = arith.constant 8 : index
    %c0_66 = arith.constant 0 : index
    %c0_67 = arith.constant 0 : index
    %88 = vector.load %arg3[%c8, %c0_66, %c0_67] : memref<9x4x8xbf16, #tpu.memory_space<vmem>>, vector<1x4x8xbf16>
    %89 = vector.shape_cast %88 : vector<1x4x8xbf16> to vector<4x8xbf16>
    %cst_68 = arith.constant dense<0.000000e+00> : vector<128x8xf32>
    %90 = tpu.matmul %87, %89, %cst_68 {dimension_numbers = #tpu.dot_dimension_numbers<[1], [0], [0], [1], [0, 0, 1, 1], [], []>} : vector<128x4xbf16>, vector<4x8xbf16>, vector<128x8xf32> -> vector<128x8xf32>
    %91 = arith.addf %81, %90 : vector<128x8xf32>
    %c0_69 = arith.constant 0 : index
    %c0_70 = arith.constant 0 : index
    %92 = vector.load %arg4[%c0_69, %c0_70] : memref<1x8xf32, #tpu.memory_space<vmem>>, vector<1x8xf32>
    %93 = vector.broadcast %92 : vector<1x8xf32> to vector<128x8xf32>
    %94 = arith.addf %91, %93 : vector<128x8xf32>
    %cst_71 = arith.constant 0.000000e+00 : f32
    %95 = vector.broadcast %cst_71 : f32 to vector<128x8xf32>
    %96 = arith.maximumf %94, %95 : vector<128x8xf32>
    %97 = arith.truncf %96 : vector<128x8xf32> to vector<128x8xbf16>
    %c0_72 = arith.constant 0 : index
    %c0_73 = arith.constant 0 : index
    %c0_74 = arith.constant 0 : index
    %98 = vector.load %arg5[%c0_72, %c0_73, %c0_74] : memref<1x128x8xbf16, #tpu.memory_space<vmem>>, vector<1x128x8xbf16>
    %99 = vector.shape_cast %98 : vector<1x128x8xbf16> to vector<128x8xbf16>
    %100 = vector.shape_cast %97 : vector<128x8xbf16> to vector<1x128x8xbf16>
    tpu.vector_store %arg5[%c0_72, %c0_73, %c0_74], %100 {strides = array<i32>} : memref<1x128x8xbf16, #tpu.memory_space<vmem>>, vector<1x128x8xbf16>,
    return
  }
  func.func @transform_0(%arg0: i32, %arg1: i32) -> (i32, i32, i32, i32) {
    %c0_i32 = arith.constant 0 : i32
    %c0_i32_0 = arith.constant 0 : i32
    %c0_i32_1 = arith.constant 0 : i32
    %c0_i32_2 = arith.constant 0 : i32
    return %arg0, %c0_i32, %c0_i32_0, %c0_i32_1 : i32, i32, i32, i32
  }
  func.func @transform_1(%arg0: i32, %arg1: i32) -> (i32, i32, i32) {
    %c0_i32 = arith.constant 0 : i32
    %c0_i32_0 = arith.constant 0 : i32
    %c0_i32_1 = arith.constant 0 : i32
    %c0_i32_2 = arith.constant 0 : i32
    return %c0_i32, %c0_i32_0, %c0_i32_1 : i32, i32, i32
  }
  func.func @transform_2(%arg0: i32, %arg1: i32) -> (i32, i32) {
    %c0_i32 = arith.constant 0 : i32
    %c0_i32_0 = arith.constant 0 : i32
    %c0_i32_1 = arith.constant 0 : i32
    return %c0_i32, %c0_i32_0 : i32, i32
  }
  func.func @transform_3(%arg0: i32, %arg1: i32) -> (i32, i32, i32) {
    %c0_i32 = arith.constant 0 : i32
    %c0_i32_0 = arith.constant 0 : i32
    return %arg0, %arg1, %c0_i32 : i32, i32, i32
  }
}

</mosaic_0001>

<bundles_post_ra>
// kernel: tpu_custom_call.1
= control target key start
LH: loop header
LB: loop body
LE: loop exit
PB: predicated region body
PF: predicated region fallthrough
CT: control target
= control target key end

     0   :  { %s3707_s12 = smov 0   ;;  %s3709_s13 = smov 0   ;;  %s4678_s0 = inlined_call_operand.vmem [shape: bf16[2,18,18,4], index: 0, kind: input, shape index: {}]   ;;  %s4679_s1 = inlined_call_operand.vmem [shape: bf16[9,4,8], index: 1, kind: input, shape index: {}]   ;;  %s4680_s2 = inlined_call_operand.vmem [shape: f32[1,8], index: 2, kind: input, shape index: {}]   ;;  %s4681_s3 = inlined_call_operand.vmem [shape: bf16[2,256,8], index: 3, kind: output, shape index: {}]  }
   0x1   :  { %s3711_s14 = smov 0   ;;  %s3713_s15 = smov 0  }
   0x2   :  { %s3715_s16 = smov 0  }
   0x3 LB: > { %s22_s17 = sadd.s32 1, %s3677_s14  ;;  %s25_s18 = sadd.s32 1, %s3681_s15  ;;  %s3685_s16 = sphi %s3715_s16, %s13_s16   ;;  %s3681_s15 = sphi %s3713_s15, %s4707_s15   ;;  %s3677_s14 = sphi %s3711_s14, %s4706_s14   ;;  %s3673_s13 = sphi %s3709_s13, %s4705_s13   ;;  %s3669_s12 = sphi %s3707_s12, %s4704_s12  }
   0x4   : > { %p23_p0 = scmp.ge.s32.totalorder %s22_s17, 2  ;;  %p2878_p1 = scmp.ge.s32.totalorder %s3685_s16, 1 }
   0x5   : > { %p151_p2 = scmp.lt.s32.totalorder %s3685_s16, 5 }
   0x6   : > { %s4709_s17 = smov (%p23_p0, %s22_s17), 0  ;;  %s4711_s18 = smov (!%p23_p0, %s25_s18), %s3681_s15 }
   0x7   : > { %p152_p3 = pnand %p2878_p1, %p151_p2  ;;  %p27_p4 = scmp.ge.s32.totalorder %s4711_s18, 2 }
   0x9   : > { %s4713_s18 = smov (%p27_p4, %s4711_s18), 0  ;;  %155 = sbr.rel (%p152_p3) target bundleno = 423 (0x1a7), region = 32 }
  0x10   : > { %v2886_v0 = vld [vmem:[%s4679_s1 + $0x2] sm:$0x3]  ;;  %vm470_vm0 = vcmask 1041408   ;;  %v3003_v1 = vld [vmem:[%s4679_s1 + $0x8] sm:$0x3]  ;;  %p179_p5 = scmp.lt.s32.totalorder %s3673_s13, 1 }
  0x11   : > { %3571 = vmatprep.subr.msk.bf16.mxu1 %vm470_vm0, %v2886_v0  ;;  %3575 = vmatprep.subr.msk.bf16.mxu0 %vm470_vm0, %v3003_v1  ;;  %v472_v2 = vsel %vm470_vm0, %v2886_v0, 0  ;;  %v3749_v3 = vsel %vm470_vm0, %v3003_v1, 0  ;;  %v215_v4 = vld [vmem:[%s4679_s1] sm:$0x3]  ;;  %s3181_s25 = smul.u32 96, %s3669_s12  ;;  %vm445_vm3 = vcmask 31744  }
  0x12   : > { %3280 = vmatpush3.bf16.msra.mxu1 %v472_v2  ;;  %3352 = vmatpush3.bf16.msra.mxu0 %v3749_v3  ;;  %s4715_s13 = smov (!%p179_p5, %s3673_s13), 1  ;;  %v3036_v5 = vld [vmem:[%s4679_s1 + $0xa] sm:$0x3]  ;;  %vm224_vm1 = vsmask.f32 3328  ;;  %v3791_v17 = vsel %vm470_vm0, %v215_v4, 0 }
  0x13   : > { %3572 = vmatprep.subr.msk.bf16.mxu1 %vm470_vm0, %v215_v4  ;;  %s3581_s28 = smul.u32 216, %s4715_s13  ;;  %3577 = vmatprep.subr.msk.bf16.mxu0 %vm470_vm0, %v3036_v5  ;;  %vm225_vm2 = vsmask.f32 7440  ;;  %v3797_v26 = vld [vmem:[%s4679_s1 + $0xc] sm:$0x3]  ;;  %v3814_v37 = vsel %vm470_vm0, %v3036_v5, 0 }
  0x14   : > { %vm3806_vm4 = vmor %vm224_vm1, %vm225_vm2  ;;  %v3818_v41 = vsel %vm470_vm0, %v3797_v26, 0  ;;  %vm759_vm5 = vcmask 1042432   ;;  %vm760_vm6 = vcmask 1046532   ;;  %s2881_s26 = sshll.u32 %s4715_s13, 5  ;;  %vm2763_vm8 = vcmask 60416  }
  0x15   : > { %s183_s4 = scalar_lea.vmem %s4678_s0, %s3581_s28  ;;  %vm3961_vm7 = vmor %vm759_vm5, %vm760_vm6 }
  0x16   : > { %s3767_s5 = scalar_lea.vmem %s183_s4, %s3181_s25  ;;  %s2880_s25 = sshll.u32 %s3669_s12, 4 }
  0x17   : > { %v3770_v6 = vld [vmem:[%s3767_s5] sm:$0xf]  ;;  %v3773_v7 = vld [vmem:[%s3767_s5 + $0x4] sm:$0xf]  ;;  %v3776_v8 = vld [vmem:[%s3767_s5 + $0x8] sm:$0x1] }
  0x18   : > { %v228_v9 = vshrl.u32 %v3770_v6, 16  ;;  %v231_v10 = vshll.u32 %v3770_v6, 16  ;;  %v237_v11 = vshll.u32 %v3773_v7, 16  ;;  %v241_v12 = vshrl.u32 %v3773_v7, 16  ;;  %v2979_v13 = vld [vmem:[%s3767_s5 + $0xc] sm:$0xf] }
  0x19   : > { %v247_v14 = vshll.u32 %v3776_v8, 16  ;;  %v3785_v15 = vld [vmem:[%s3767_s5 + $0x10] sm:$0xf]  ;;  %v3788_v16 = vld [vmem:[%s3767_s5 + $0x14] sm:$0x1]  ;;  %v1211_v23 = vshrl.u32 %v2979_v13, 16 }
  0x1a   : > { %v230_v18 = vrot.slane %v228_v9, 4  ;;  %v233_v19 = vrot.slane %v231_v10, 5  ;;  %v239_v20 = vrot.slane %v237_v11, 5  ;;  %v243_v21 = vrot.slane %v241_v12, 4  ;;  %v3802_v31 = vld [vmem:[%s3767_s5 + $0xc] sm:$0xf] }
  0x1b   : > { %v249_v22 = vrot.slane %v247_v14, 5  ;;  %v1214_v24 = vshll.u32 %v2979_v13, 16  ;;  %v1220_v25 = vshll.u32 %v3785_v15, 16  ;;  %v1224_v29 = vshrl.u32 %v3785_v15, 16  ;;  %v3811_v36 = vld [vmem:[%s3767_s5 + $0x10] sm:$0xf] }
  0x1c   : > { %v234_v27 = vor.u32 %v233_v19, %v230_v18  ;;  %v244_v28 = vor.u32 %v243_v21, %v239_v20  ;;  %v1230_v30 = vshll.u32 %v3788_v16, 16  ;;  %v1213_v33 = vrot.slane %v1211_v23, 4  ;;  %v3821_v44 = vld [vmem:[%s3767_s5 + $0x14] sm:$0x1]  ;;  %v2982_v55 = vld [vmem:[%s3767_s5 + $0x18] sm:$0xf] }
  0x1d   : > { %v1216_v34 = vrot.slane %v1214_v24, 5  ;;  %v1222_v35 = vrot.slane %v1220_v25, 5  ;;  %v1226_v40 = vrot.slane %v1224_v29, 4  ;;  %v252_v45 = vshrl.u32 %v3802_v31, 16  ;;  %v3834_v60 = vld [vmem:[%s3767_s5 + $0x1c] sm:$0xf] }
  0x1e   : > { %v235_v38 = vrot.slane %v234_v27, 4  ;;  %v245_v39 = vrot.slane %v244_v28, 4  ;;  %v1232_v43 = vrot.slane %v1230_v30, 5  ;;  %v255_v46 = vshll.u32 %v3802_v31, 16  ;;  %v3842_v1 = vld [vmem:[%s3767_s5 + $0x20] sm:$0x1] }
  0x1f   : > { %v1217_v42 = vor.u32 %v1216_v34, %v1213_v33  ;;  %v1227_v49 = vor.u32 %v1226_v40, %v1222_v35  ;;  %v261_v50 = vshll.u32 %v3811_v36, 16  ;;  %v254_v53 = vrot.slane %v252_v45, 4  ;;  %v3850_v21 = vld [vmem:[%s3767_s5 + $0x18] sm:$0xf]  ;;  %v3857_v27 = vld [vmem:[%s3767_s5 + $0x1c] sm:$0xf] }
  0x20   : > { %v240_v47 = vsel %vm3806_vm4, %v235_v38, %v239_v20  ;;  %v250_v48 = vsel %vm3806_vm4, %v245_v39, %v249_v22  ;;  %v257_v54 = vrot.slane %v255_v46, 5  ;;  %v265_v58 = vshrl.u32 %v3811_v36, 16  ;;  %v3865_v38 = vld [vmem:[%s3767_s5 + $0x20] sm:$0x1]  ;;  %p187_p6 = scmp.lt.s32.totalorder %s2880_s25, 31 }
  0x21   : > { %v2887_v51 = vcombine.low %v240_v47, %v250_v48  ;;  %v1218_v52 = vrot.slane %v1217_v42, 4  ;;  %v1228_v56 = vrot.slane %v1227_v49, 4  ;;  %v263_v57 = vrot.slane %v261_v50, 5  ;;  %v2985_v47 = vld [vmem:[%s3767_s5 + $0x24] sm:$0xf] }
  0x22   : > { %v271_v59 = vshll.u32 %v3821_v44, 16  ;;  %v1602_v62 = vrot.slane %v3785_v15, 5  ;;  %v1605_v63 = vrot.slane %v3788_v16, 5  ;;  %v258_v0 = vor.u32 %v257_v54, %v254_v53  ;;  %s4717_s25 = smov (!%p187_p6, %s2880_s25), 31 }
  0x23   : > { %3281 = vmatprep.mubr.msk.bf16.mxu1 %vm445_vm3, %v2887_v51  ;;  %v1223_v61 = vsel %vm3806_vm4, %v1218_v52, %v1222_v35  ;;  %v1233_v2 = vsel %vm3806_vm4, %v1228_v56, %v1232_v43  ;;  %v267_v4 = vrot.slane %v265_v58, 4  ;;  %v1235_v9 = vshrl.u32 %v2982_v55, 16  ;;  %v3875_v52 = vld [vmem:[%s3767_s5 + $0x28] sm:$0xf]  ;;  %s190_s27 = sadd.s32 %s2881_s26, %s4717_s25 }
  0x24   : > { %v273_v5 = vrot.slane %v271_v59, 5  ;;  %v3004_v10 = vcombine.low %v1223_v61, %v1233_v2  ;;  %v259_v11 = vrot.slane %v258_v0, 4  ;;  %v1238_v12 = vshll.u32 %v2982_v55, 16  ;;  %v3887_v61 = vld [vmem:[%s3767_s5 + $0x2c] sm:$0x1]  ;;  %s2882_s30 = sshll.u32 %s190_s27, 2 }
  0x25   : > { %v1244_v13 = vshll.u32 %v3834_v60, 16  ;;  %v268_v14 = vor.u32 %v267_v4, %v263_v57  ;;  %v1237_v18 = vrot.slane %v1235_v9, 4  ;;  %v1248_v19 = vshrl.u32 %v3834_v60, 16  ;;  %s4616_s4 = scalar_lea.vmem %s4681_s3, %s2882_s30 }
  0x26   : > { %v1254_v20 = vshll.u32 %v3842_v1, 16  ;;  %3353 = vmatprep.mubr.msk.bf16.mxu0 %vm445_vm3, %v3004_v10  ;;  %v264_v22 = vsel %vm3806_vm4, %v259_v11, %v263_v57  ;;  %v1240_v23 = vrot.slane %v1238_v12, 5  ;;  %v1609_v25 = vrot.slane %v3834_v60, 5  ;;  %v3881_v57 = vld [vmem:[%s4679_s1 + $0x4] sm:$0x3] }
  0x27   : > { %v1246_v24 = vrot.slane %v1244_v13, 5  ;;  %v269_v28 = vrot.slane %v268_v14, 4  ;;  %v1250_v29 = vrot.slane %v1248_v19, 4  ;;  %v1612_v33 = vrot.slane %v3842_v1, 5  ;;  %v3894_v11 = vld [vmem:[%s3767_s5 + $0x24] sm:$0xf] }
  0x28   : > { %v1256_v30 = vrot.slane %v1254_v20, 5  ;;  %v1241_v34 = vor.u32 %v1240_v23, %v1237_v18  ;;  %v3862_v35 = vrot.slane %v1609_v25, 4  ;;  %v276_v39 = vshrl.u32 %v3850_v21, 16  ;;  %v3897_v19 = vld [vmem:[%s3767_s5 + $0x28] sm:$0xf] }
  0x29   : > { %v279_v40 = vshll.u32 %v3850_v21, 16  ;;  %v274_v42 = vsel %vm3806_vm4, %v269_v28, %v273_v5  ;;  %v1251_v43 = vor.u32 %v1250_v29, %v1246_v24  ;;  %v285_v45 = vshll.u32 %v3857_v27, 16  ;;  %v3907_v29 = vld [vmem:[%s3767_s5 + $0x2c] sm:$0x1] }
  0x2a   : > { %v289_v46 = vshrl.u32 %v3857_v27, 16  ;;  %v2888_v48 = vcombine.low %v264_v22, %v274_v42  ;;  %v1242_v49 = vrot.slane %v1241_v34, 4  ;;  %v278_v50 = vrot.slane %v276_v39, 4 }
  0x2b   : > { %v281_v51 = vrot.slane %v279_v40, 5  ;;  %v1252_v53 = vrot.slane %v1251_v43, 4  ;;  %v287_v54 = vrot.slane %v285_v45, 5  ;;  %v295_v56 = vshll.u32 %v3865_v38, 16  ;;  %v2988_v45 = vld [vmem:[%s3767_s5 + $0x30] sm:$0xf] }
  0x2c   : > { %v291_v55 = vrot.slane %v289_v46, 4  ;;  %3282 = vmatmul.mubr.msk.bf16.vlgmr.msra.gmra.mrb[0].mxu1 %vm445_vm3, %v2888_v48  ;;  %v1247_v58 = vsel %vm3806_vm4, %v1242_v49, %v1246_v24  ;;  %v1259_v0 = vshrl.u32 %v2985_v47, 16  ;;  %v1262_v2 = vshll.u32 %v2985_v47, 16 }
  0x2d   : > { %v282_v59 = vor.u32 %v281_v51, %v278_v50  ;;  %3298 = vmatpush3.bf16.msra.mxu1 %v3791_v17  ;;  %v1257_v4 = vsel %vm3806_vm4, %v1252_v53, %v1256_v30  ;;  %v297_v9 = vrot.slane %v295_v56, 5  ;;  %v1268_v10 = vshll.u32 %v3875_v52, 16  ;;  %v3917_v50 = vld [vmem:[%s3767_s5 + $0x34] sm:$0xf] }
  0x2e   : > { %v292_v5 = vor.u32 %v291_v55, %v287_v54  ;;  %v3005_v12 = vcombine.low %v1247_v58, %v1257_v4  ;;  %v1261_v14 = vrot.slane %v1259_v0, 4  ;;  %v1264_v18 = vrot.slane %v1262_v2, 5  ;;  %3573 = vmatprep.subr.msk.bf16.mxu1 %vm470_vm0, %v3881_v57  ;;  %v3927_v58 = vld [vmem:[%s3767_s5 + $0x38] sm:$0x1] }
  0x2f   : > { %v283_v13 = vrot.slane %v282_v59, 4  ;;  %v1270_v20 = vrot.slane %v1268_v10, 5  ;;  %v1272_v22 = vshrl.u32 %v3875_v52, 16  ;;  %v1278_v23 = vshll.u32 %v3887_v61, 16 }
  0x30   : > { %v293_v17 = vrot.slane %v292_v5, 4  ;;  %3354 = vmatmul.mubr.msk.bf16.vlgmr.msra.gmra.mrb[0].mxu0 %vm445_vm3, %v3005_v12  ;;  %v1265_v28 = vor.u32 %v1264_v18, %v1261_v14  ;;  %v300_v30 = vshrl.u32 %v3894_v11, 16  ;;  %v303_v34 = vshll.u32 %v3894_v11, 16  ;;  %v3932_v14 = vld [vmem:[%s3767_s5 + $0x30] sm:$0xf] }
  0x31   : > { %v288_v24 = vsel %vm3806_vm4, %v283_v13, %v287_v54  ;;  %3370 = vmatpush3.bf16.msra.mxu0 %v3814_v37  ;;  %v1274_v40 = vrot.slane %v1272_v22, 4  ;;  %v1280_v42 = vrot.slane %v1278_v23, 5  ;;  %v309_v43 = vshll.u32 %v3897_v19, 16  ;;  %v3938_v23 = vld [vmem:[%s3767_s5 + $0x34] sm:$0xf] }
  0x32   : > { %v298_v39 = vsel %vm3806_vm4, %v293_v17, %v297_v9  ;;  %v1266_v47 = vrot.slane %v1265_v28, 4  ;;  %v302_v48 = vrot.slane %v300_v30, 4  ;;  %v305_v49 = vrot.slane %v303_v34, 5  ;;  %3578 = vmatprep.subr.msk.bf16.mxu0 %vm470_vm0, %v3797_v26 }
  0x33   : > { %v2889_v46 = vcombine.low %v288_v24, %v298_v39  ;;  %v1275_v37 = vor.u32 %v1274_v40, %v1270_v20  ;;  %v311_v51 = vrot.slane %v309_v43, 5  ;;  %v313_v53 = vshrl.u32 %v3897_v19, 16  ;;  %v3943_v39 = vld [vmem:[%s3767_s5 + $0x38] sm:$0x1] }
  0x34   : > { %v319_v54 = vshll.u32 %v3907_v29, 16  ;;  %v1271_v55 = vsel %vm3806_vm4, %v1266_v47, %v1270_v20  ;;  %v306_v56 = vor.u32 %v305_v49, %v302_v48  ;;  %v1283_v59 = vshrl.u32 %v2988_v45, 16 }
  0x35   : > { %3285 = vmatprep.mubr.msk.bf16.mxu1 %vm445_vm3, %v2889_v46  ;;  %v1286_v0 = vshll.u32 %v2988_v45, 16  ;;  %v1276_v2 = vrot.slane %v1275_v37, 4  ;;  %v315_v26 = vrot.slane %v313_v53, 4  ;;  %v1292_v5 = vshll.u32 %v3917_v50, 16  ;;  %v3020_v37 = vld [vmem:[%s3767_s5 + $0xc] sm:$0xe] }
  0x36   : > { %v321_v4 = vrot.slane %v319_v54, 5  ;;  %v307_v9 = vrot.slane %v306_v56, 4  ;;  %v1285_v10 = vrot.slane %v1283_v59, 4  ;;  %v1296_v13 = vshrl.u32 %v3917_v50, 16  ;;  %v3955_v56 = vld [vmem:[%s3767_s5 + $0x3c] sm:$0xf] }
  0x37   : > { %v1288_v12 = vrot.slane %v1286_v0, 5  ;;  %v1281_v18 = vsel %vm3806_vm4, %v1276_v2, %v1280_v42  ;;  %v316_v17 = vor.u32 %v315_v26, %v311_v51  ;;  %v1294_v20 = vrot.slane %v1292_v5, 5 }
  0x38   : > { %v1302_v22 = vshll.u32 %v3927_v58, 16  ;;  %v3006_v24 = vcombine.low %v1271_v55, %v1281_v18  ;;  %v312_v28 = vsel %vm3806_vm4, %v307_v9, %v311_v51  ;;  %v1298_v34 = vrot.slane %v1296_v13, 4  ;;  %v3969_v18 = vld [vmem:[%s3767_s5 + $0x44] sm:$0x1] }
  0x39   : > { %v1289_v30 = vor.u32 %v1288_v12, %v1285_v10  ;;  %v317_v40 = vrot.slane %v316_v17, 4  ;;  %v324_v42 = vshrl.u32 %v3932_v14, 16  ;;  %v327_v45 = vshll.u32 %v3932_v14, 16  ;;  %v3021_v17 = vld [vmem:[%s3767_s5 + $0x18] sm:$0xe] }
  0x3a   : > { %v1304_v43 = vrot.slane %v1302_v22, 5  ;;  %3357 = vmatprep.mubr.msk.bf16.mxu0 %vm445_vm3, %v3006_v24  ;;  %v1299_v47 = vor.u32 %v1298_v34, %v1294_v20  ;;  %v333_v48 = vshll.u32 %v3938_v23, 16  ;;  %v337_v49 = vshrl.u32 %v3938_v23, 16 }
  0x3b   : > { %v1290_v46 = vrot.slane %v1289_v30, 4  ;;  %v322_v51 = vsel %vm3806_vm4, %v317_v40, %v321_v4  ;;  %v326_v53 = vrot.slane %v324_v42, 4  ;;  %v329_v54 = vrot.slane %v327_v45, 5  ;;  %v3966_v4 = vld [vmem:[%s3767_s5 + $0x40] sm:$0xf] }
  0x3c   : > { %v343_v55 = vshll.u32 %v3943_v39, 16  ;;  %v2890_v59 = vcombine.low %v312_v28, %v322_v51  ;;  %v1300_v2 = vrot.slane %v1299_v47, 4  ;;  %v335_v26 = vrot.slane %v333_v48, 5  ;;  %v3980_v30 = vld [vmem:[%s3767_s5 + $0x48] sm:$0xf] }
  0x3d   : > { %v1295_v0 = vsel %vm3806_vm4, %v1290_v46, %v1294_v20  ;;  %v330_v9 = vor.u32 %v329_v54, %v326_v53  ;;  %v339_v10 = vrot.slane %v337_v49, 4  ;;  %v3028_v13 = vrot.slane %v3020_v37, 9 }
  0x3e   : > { %v345_v12 = vrot.slane %v343_v55, 5  ;;  %3286 = vmatmul.mubr.msk.bf16.gmra.mrb[4].mxu1 %vm445_vm3, %v2890_v59  ;;  %v1305_v20 = vsel %vm3806_vm4, %v1300_v2, %v1304_v43  ;;  %v1604_v22 = vrot.slane %v1602_v62, 4  ;;  %v348_v24 = vshrl.u32 %v3955_v56, 16  ;;  %v4000_v55 = vld [vmem:[%s3767_s5 + $0x50] sm:$0x1] }
  0x3f   : > { %v351_v28 = vshll.u32 %v3955_v56, 16  ;;  %v3007_v34 = vcombine.low %v1295_v0, %v1305_v20  ;;  %v331_v40 = vrot.slane %v330_v9, 4  ;;  %v340_v42 = vor.u32 %v339_v10, %v335_v26 }
  0x40   : > { %v1603_v45 = vsel %vm3961_vm7, %v3028_v13, %v1602_v62  ;;  %v1606_v43 = vsel %vm3961_vm7, %v1604_v22, %v1605_v63  ;;  %v350_v46 = vrot.slane %v348_v24, 4  ;;  %v357_v48 = vshll.u32 %v3966_v4, 16  ;;  %v3996_v62 = vld [vmem:[%s3767_s5 + $0x4c] sm:$0xf] }
  0x41   : > { %v353_v47 = vrot.slane %v351_v28, 5  ;;  %3358 = vmatmul.mubr.msk.bf16.gmra.mrb[4].mxu0 %vm445_vm3, %v3007_v34  ;;  %v336_v49 = vsel %vm3806_vm4, %v331_v40, %v335_v26  ;;  %v341_v37 = vrot.slane %v340_v42, 4  ;;  %v3037_v15 = vcombine.low %v1603_v45, %v1606_v43  ;;  %v4018_v28 = vld [vmem:[%s3767_s5 + $0x54] sm:$0xf]  ;;  %v4029_v34 = vld [vmem:[%s4679_s1 + $0xe] sm:$0x3] }
  0x42   : > { %v361_v51 = vshrl.u32 %v3966_v4, 16  ;;  %v359_v53 = vrot.slane %v357_v48, 5  ;;  %v367_v63 = vshll.u32 %v3969_v18, 16  ;;  %v3029_v54 = vrot.slane %v3021_v17, 9 }
  0x43   : > { %v354_v16 = vor.u32 %v353_v47, %v350_v46  ;;  %v346_v59 = vsel %vm3806_vm4, %v341_v37, %v345_v12  ;;  %3371 = vmatprep.mubr.msk.bf16.mxu0 %vm445_vm3, %v3037_v15  ;;  %v1613_v2 = vsel %vm3961_vm7, %v3862_v35, %v1612_v33  ;;  %v372_v26 = vshrl.u32 %v3980_v30, 16  ;;  %v3022_v12 = vld [vmem:[%s3767_s5 + $0x24] sm:$0xe]  ;;  %v4034_v37 = vld [vmem:[%s3767_s5 + $0x58] sm:$0xf] }
  0x44   : > { %v363_v0 = vrot.slane %v361_v51, 4  ;;  %v2891_v9 = vcombine.low %v336_v49, %v346_v59  ;;  %v369_v13 = vrot.slane %v367_v63, 5  ;;  %v1610_v17 = vsel %vm3961_vm7, %v3029_v54, %v1609_v25  ;;  %v4043_v54 = vld [vmem:[%s3767_s5 + $0x5c] sm:$0x1] }
  0x45   : > { %v355_v10 = vrot.slane %v354_v16, 4  ;;  %v3038_v22 = vcombine.low %v1610_v17, %v1613_v2  ;;  %v374_v24 = vrot.slane %v372_v26, 4  ;;  %v375_v1 = vshll.u32 %v3980_v30, 16 }
  0x46   : > { %v364_v20 = vor.u32 %v363_v0, %v359_v53  ;;  %3289 = vmatprep.mubr.msk.bf16.mxu1 %vm445_vm3, %v2891_v9  ;;  %v381_v35 = vshll.u32 %v3996_v62, 16  ;;  %v385_v60 = vshrl.u32 %v3996_v62, 16  ;;  %v391_v25 = vshll.u32 %v4000_v55, 16 }
  0x47   : > { %v360_v33 = vsel %vm3806_vm4, %v355_v10, %v359_v53  ;;  %v377_v42 = vrot.slane %v375_v1, 5  ;;  %v3030_v45 = vrot.slane %v3022_v12, 9  ;;  %v1616_v43 = vrot.slane %v3875_v52, 5  ;;  %v3023_v10 = vld [vmem:[%s3767_s5 + $0x30] sm:$0xe] }
  0x48   : > { %v365_v40 = vrot.slane %v364_v20, 4  ;;  %v383_v46 = vrot.slane %v381_v35, 5  ;;  %v387_v47 = vrot.slane %v385_v60, 4  ;;  %v393_v48 = vrot.slane %v391_v25, 5 }
  0x49   : > { %v1619_v49 = vrot.slane %v3887_v61, 5  ;;  %3372 = vmatmul.mubr.msk.bf16.vlgmr.msra.gmra.mrb[0].mxu0 %vm445_vm3, %v3038_v22  ;;  %v378_v51 = vor.u32 %v377_v42, %v374_v24  ;;  %v1617_v16 = vsel %vm3961_vm7, %v3030_v45, %v1616_v43  ;;  %v1618_v53 = vrot.slane %v1616_v43, 4  ;;  %v4064_v42 = vld [vmem:[%s3767_s5 + $0x40] sm:$0xf]  ;;  %v4067_v45 = vld [vmem:[%s3767_s5 + $0x44] sm:$0x1] }
  0x4a   : > { %v370_v15 = vsel %vm3806_vm4, %v365_v40, %v369_v13  ;;  %3388 = vmatpush3.bf16.msra.mxu0 %v3818_v41  ;;  %v388_v52 = vor.u32 %v387_v47, %v383_v46  ;;  %v396_v61 = vshrl.u32 %v4018_v28, 16  ;;  %v399_v59 = vshll.u32 %v4018_v28, 16 }
  0x4b   : > { %v2892_v63 = vcombine.low %v360_v33, %v370_v15  ;;  %v379_v0 = vrot.slane %v378_v51, 4  ;;  %v1620_v2 = vsel %vm3961_vm7, %v1618_v53, %v1619_v49  ;;  %v405_v26 = vshll.u32 %v4034_v37, 16  ;;  %3579 = vmatprep.subr.msk.bf16.mxu0 %vm470_vm0, %v4029_v34  ;;  %v3024_v33 = vld [vmem:[%s3767_s5 + $0x3c] sm:$0xe] }
  0x4c   : > { %v409_v9 = vshrl.u32 %v4034_v37, 16  ;;  %v389_v41 = vrot.slane %v388_v52, 4  ;;  %v3039_v13 = vcombine.low %v1617_v16, %v1620_v2  ;;  %v398_v17 = vrot.slane %v396_v61, 4  ;;  %v3025_v2 = vld [vmem:[%s3767_s5 + $0x48] sm:$0xe] }
  0x4d   : > { %3290 = vmatmul.mubr.msk.bf16.gmra.mrb[8].mxu1 %vm445_vm3, %v2892_v63  ;;  %v401_v12 = vrot.slane %v399_v59, 5  ;;  %v384_v20 = vsel %vm3806_vm4, %v379_v0, %v383_v46  ;;  %v407_v22 = vrot.slane %v405_v26, 5  ;;  %v415_v1 = vshll.u32 %v4043_v54, 16  ;;  %v4082_v59 = vld [vmem:[%s3767_s5 + $0x4c] sm:$0xf] }
  0x4e   : > { %v411_v24 = vrot.slane %v409_v9, 4  ;;  %v394_v35 = vsel %vm3806_vm4, %v389_v41, %v393_v48  ;;  %3375 = vmatprep.mubr.msk.bf16.mxu0 %vm445_vm3, %v3039_v13  ;;  %v3031_v25 = vrot.slane %v3023_v10, 9  ;;  %v1623_v40 = vrot.slane %v3917_v50, 5  ;;  %v4085_v0 = vld [vmem:[%s3767_s5 + $0x50] sm:$0x1] }
  0x4f   : > { %v402_v60 = vor.u32 %v401_v12, %v398_v17  ;;  %v2893_v43 = vcombine.low %v384_v20, %v394_v35  ;;  %v417_v47 = vrot.slane %v415_v1, 5  ;;  %v1626_v49 = vrot.slane %v3927_v58, 5  ;;  %v4093_v17 = vld [vmem:[%s3767_s5 + $0x58] sm:$0xf]  ;;  %v4096_v12 = vld [vmem:[%s3767_s5 + $0x5c] sm:$0x1] }
  0x50   : > { %v412_v46 = vor.u32 %v411_v24, %v407_v22  ;;  %v1624_v48 = vsel %vm3961_vm7, %v3031_v25, %v1623_v40  ;;  %v1625_v51 = vrot.slane %v1623_v40, 4  ;;  %v3032_v16 = vrot.slane %v3024_v33, 9  ;;  %4691 = vst [vmem:[#allocation2_spill] sm:$0xff] %v4096_v12  ;;  %v4106_v35 = vld [vmem:[%s3767_s5 + $0x64] sm:$0xf] }
  0x51   : > { %v403_v15 = vrot.slane %v402_v60, 4  ;;  %3293 = vmatprep.mubr.msk.bf16.mxu1 %vm445_vm3, %v2893_v43  ;;  %v1630_v53 = vrot.slane %v4064_v42, 5  ;;  %v1633_v63 = vrot.slane %v4067_v45, 5  ;;  %v2903_v61 = vcombine.low %v3770_v6, %v3773_v7  ;;  %v3026_v6 = vld [vmem:[%s3767_s5 + $0x54] sm:$0xe]  ;;  %4692 = vst [vmem:[#allocation3_spill] sm:$0xff] %v4106_v35 }
  0x52   : > { %v413_v50 = vrot.slane %v412_v46, 4  ;;  %v1627_v58 = vsel %vm3961_vm7, %v1625_v51, %v1626_v49  ;;  %v1637_v24 = vrot.slane %v4082_v59, 5  ;;  %v1640_v1 = vrot.slane %v4085_v0, 5  ;;  %v4109_v60 = vld [vmem:[%s3767_s5 + $0x68] sm:$0x1] }
  0x53   : > { %v408_v52 = vsel %vm3806_vm4, %v403_v15, %v407_v22  ;;  %v3040_v9 = vcombine.low %v1624_v48, %v1627_v58  ;;  %v1631_v10 = vsel %vm3961_vm7, %v3032_v16, %v1630_v53  ;;  %v1632_v41 = vrot.slane %v1630_v53, 4  ;;  %4693 = vst [vmem:[#allocation4_spill] sm:$0xff] %v4109_v60 }
  0x54   : > { %v418_v26 = vsel %vm3806_vm4, %v413_v50, %v417_v47  ;;  %v3033_v22 = vrot.slane %v3025_v2, 9  ;;  %v1639_v40 = vrot.slane %v1637_v24, 4  ;;  %v3034_v43 = vrot.slane %v3026_v6, 9  ;;  %v3027_v47 = vld [vmem:[%s3767_s5 + $0x60] sm:$0xe] }
  0x55   : > { %v2894_v13 = vcombine.low %v408_v52, %v418_v26  ;;  %3376 = vmatmul.mubr.msk.bf16.gmra.mrb[4].mxu0 %vm445_vm3, %v3040_v9  ;;  %v1634_v20 = vsel %vm3961_vm7, %v1632_v41, %v1633_v63  ;;  %v1644_v46 = vrot.slane %v4093_v17, 5  ;;  %v771_v49 = vrot.slane %v3811_v36, 5  ;;  %v737_v2 = vld [vmem:[%s3767_s5 + $0x18] sm:$0xe]  ;;  %v4141_v6 = vld [vmem:[%s4679_s1 + $0x6] sm:$0x3] }
  0x56   : > { %v3041_v33 = vcombine.low %v1631_v10, %v1634_v20  ;;  %v1638_v25 = vsel %vm3961_vm7, %v3033_v22, %v1637_v24  ;;  %v1647_v15 = vrot.slane %v4096_v12, 5  ;;  %v1641_v48 = vsel %vm3961_vm7, %v1639_v40, %v1640_v1  ;;  %v739_v1 = vld [vmem:[%s3767_s5 + $0x30] sm:$0xe] }
  0x57   : > { %3294 = vmatmul.mubr.msk.bf16.gmra.mrb[12].mxu1 %vm445_vm3, %v2894_v13  ;;  %v1645_v51 = vsel %vm3961_vm7, %v3034_v43, %v1644_v46  ;;  %v1646_v16 = vrot.slane %v1644_v46, 4  ;;  %v1651_v50 = vrot.slane %v4106_v35, 5  ;;  %v2904_v53 = vcombine.low %v3802_v31, %v3811_v36  ;;  %v738_v36 = vld [vmem:[%s3767_s5 + $0x24] sm:$0xe]  ;;  %v4415_v12 = vld [vmem:[%s3767_s5 + $0x70] sm:$0xf] }
  0x58   : > { %3299 = vmatprep.mubr.msk.bf16.mxu1 %vm445_vm3, %v2903_v61  ;;  %3379 = vmatprep.mubr.msk.bf16.mxu0 %vm445_vm3, %v3041_v33  ;;  %v3042_v63 = vcombine.low %v1638_v25, %v1641_v48  ;;  %v3035_v52 = vrot.slane %v3027_v47, 9  ;;  %v1654_v58 = vrot.slane %v4109_v60, 5  ;;  %v736_v61 = vld [vmem:[%s3767_s5 + $0xc] sm:$0xe]  ;;  %v774_v26 = vrot.slane %v3821_v44, 5 }
  0x59   : > { %v2905_v9 = vcombine.low %v3850_v21, %v3857_v27  ;;  %v1648_v10 = vsel %vm3961_vm7, %v1646_v16, %v1647_v15  ;;  %v1653_v41 = vrot.slane %v1651_v50, 4  ;;  %v869_v13 = vsel %vm470_vm0, %v3881_v57, 0  ;;  %v3627_v16 = vld [vmem:[%s3767_s5 + $0x18] sm:$0xff]   ;;  %v4387_v60 = vld [vmem:[%s3767_s5 + $0x64] sm:$0xf] }
  0x5a   : > { %v3043_v31 = vcombine.low %v1645_v51, %v1648_v10  ;;  %v2920_v44 = vrot.slane %v736_v61, 9  ;;  %v773_v20 = vrot.slane %v771_v49, 4  ;;  %v2921_v21 = vrot.slane %v737_v2, 9  ;;  %4694 = vst [vmem:[#allocation5_spill] sm:$0xff] %v4387_v60 }
  0x5b   : > { %v1652_v22 = vsel %vm3961_vm7, %v3035_v52, %v1651_v50  ;;  %v1655_v57 = vsel %vm3961_vm7, %v1653_v41, %v1654_v58  ;;  %v778_v24 = vrot.slane %v3857_v27, 5  ;;  %v781_v40 = vrot.slane %v3865_v38, 5 }
  0x5c   : > { %v4154_v33 = vsel %vm3961_vm7, %v2920_v44, %v771_v49  ;;  %v4158_v25 = vsel %vm3961_vm7, %v773_v20, %v774_v26  ;;  %v2922_v43 = vrot.slane %v738_v36, 9  ;;  %v3044_v49 = vcombine.low %v1652_v22, %v1655_v57  ;;  %v3088_v26 = vld [vmem:[%s3767_s5 + $0x18] sm:$0xf]  ;;  %v3629_v57 = vld [vmem:[%s3767_s5 + $0x24] sm:$0xff]  }
  0x5d   : > { %3380 = vmatmul.mubr.msk.bf16.gmra.mrb[8].mxu0 %vm445_vm3, %v3042_v63  ;;  %v2929_v27 = vcombine.low %v4154_v33, %v4158_v25  ;;  %v4167_v46 = vsel %vm3961_vm7, %v2921_v21, %v778_v24  ;;  %v780_v47 = vrot.slane %v778_v24, 4  ;;  %v785_v15 = vrot.slane %v3897_v19, 5 }
  0x5e   : > { %3383 = vmatprep.mubr.msk.bf16.mxu0 %vm445_vm3, %v3043_v31  ;;  %v788_v48 = vrot.slane %v3907_v29, 5  ;;  %v2923_v38 = vrot.slane %v739_v1, 9  ;;  %v2906_v51 = vcombine.low %v3894_v11, %v3897_v19  ;;  %v795_v63 = vrot.slane %v3943_v39, 5  ;;  %v740_v19 = vld [vmem:[%s3767_s5 + $0x3c] sm:$0xe] }
  0x5f   : > { %3300 = vmatmul.mubr.msk.bf16.vlgmr.msra.gmra.mrb[0].mxu1 %vm445_vm3, %v2904_v53  ;;  %v4176_v50 = vsel %vm3961_vm7, %v780_v47, %v781_v40  ;;  %v792_v53 = vrot.slane %v3938_v23, 5  ;;  %v2907_v52 = vcombine.low %v3932_v14, %v3938_v23  ;;  %v4186_v58 = vsel %vm3961_vm7, %v2922_v43, %v785_v15  ;;  %v735_v14 = vld [vmem:[%s3767_s5] sm:$0xe]  ;;  %v4214_v31 = vld [vmem:[%s3767_s5 + $0x1c] sm:$0xf] }
  0x60   : > { %3316 = vmatpush3.bf16.msra.mxu1 %v869_v13  ;;  %3303 = vmatprep.mubr.msk.bf16.mxu1 %vm445_vm3, %v2905_v9  ;;  %v2930_v29 = vcombine.low %v4167_v46, %v4176_v50  ;;  %v787_v11 = vrot.slane %v785_v15, 4  ;;  %v764_v61 = vrot.slane %v3773_v7, 5  ;;  %v2924_v10 = vrot.slane %v740_v19, 9  ;;  %v741_v1 = vld [vmem:[%s3767_s5 + $0x48] sm:$0xe] }
  0x61   : > { %3574 = vmatprep.subr.msk.bf16.mxu1 %vm470_vm0, %v4141_v6  ;;  %v4192_v2 = vsel %vm3961_vm7, %v2923_v38, %v792_v53  ;;  %v794_v39 = vrot.slane %v792_v53, 4  ;;  %v767_v41 = vrot.slane %v3776_v8, 5  ;;  %v2919_v36 = vrot.slane %v735_v14, 9  ;;  %v4240_v38 = vld [vmem:[%s4679_s1 + $0x10] sm:$0x3] }
  0x62   : > { %v4198_v23 = vsel %vm3961_vm7, %v787_v11, %v788_v48  ;;  %v766_v44 = vrot.slane %v764_v61, 4  ;;  %v799_v20 = vrot.slane %v3966_v4, 5  ;;  %v802_v21 = vrot.slane %v3969_v18, 5  ;;  %v4261_v14 = vld [vmem:[%s3767_s5 + $0x28] sm:$0xf] }
  0x63   : > { %v4207_v9 = vsel %vm3961_vm7, %v794_v39, %v795_v63  ;;  %v2908_v22 = vcombine.low %v3955_v56, %v3966_v4  ;;  %v2049_v24 = vshrl.u32 %v3088_v26, 16  ;;  %v2052_v8 = vshll.u32 %v3088_v26, 16  ;;  %v3631_v4 = vld [vmem:[%s3767_s5 + $0x30] sm:$0xff]   ;;  %v4363_v46 = vld [vmem:[%s3767_s5 + $0x44] sm:$0x1] }
  0x64   : > { %v2058_v40 = vshll.u32 %v4214_v31, 16  ;;  %v2062_v43 = vshrl.u32 %v4214_v31, 16  ;;  %v4226_v47 = vsel %vm3961_vm7, %v2924_v10, %v799_v20  ;;  %v2291_v18 = vsel %vm470_vm0, %v4029_v34, 0  ;;  %v3106_v7 = vld [vmem:[%s3767_s5 + $0x60] sm:$0xf] }
  0x65   : > { %3384 = vmatmul.mubr.msk.bf16.gmra.mrb[12].mxu0 %vm445_vm3, %v3044_v49  ;;  %v801_v49 = vrot.slane %v799_v20, 4  ;;  %v2909_v56 = vcombine.low %v3980_v30, %v3996_v62  ;;  %v765_v15 = vsel %vm3961_vm7, %v2919_v36, %v764_v61  ;;  %v768_v48 = vsel %vm3961_vm7, %v766_v44, %v767_v41  ;;  %v4248_v30 = vld [vmem:[%s3767_s5 + $0x20] sm:$0x1]  ;;  %v3091_v61 = vld [vmem:[%s3767_s5 + $0x24] sm:$0xf] }
  0x66   : > { %3389 = vmatprep.mubr.msk.bf16.mxu0 %vm445_vm3, %v3627_v16  ;;  %v2925_v34 = vrot.slane %v741_v1, 9  ;;  %v2051_v16 = vrot.slane %v2049_v24, 4  ;;  %v2054_v53 = vrot.slane %v2052_v8, 5  ;;  %v4254_v11 = vrot.slane %v2058_v40, 5  ;;  %v742_v44 = vld [vmem:[%s3767_s5 + $0x54] sm:$0xe] }
  0x67   : > { %3304 = vmatmul.mubr.msk.bf16.gmra.mrb[4].mxu1 %vm445_vm3, %v2906_v51  ;;  %v4244_v51 = vsel %vm3961_vm7, %v801_v49, %v802_v21  ;;  %v2064_v19 = vrot.slane %v2062_v43, 4  ;;  %v809_v39 = vrot.slane %v4000_v55, 5  ;;  %v2910_v10 = vcombine.low %v4018_v28, %v4034_v37  ;;  %v3094_v55 = vld [vmem:[%s3767_s5 + $0x30] sm:$0xf]  ;;  %v3633_v20 = vld [vmem:[%s3767_s5 + $0x3c] sm:$0xff]   ;;  %v3634_v1 = vld [vmem:[%s3767_s5 + $0x48] sm:$0xff]  }
  0x68   : > { %3307 = vmatprep.mubr.msk.bf16.mxu1 %vm445_vm3, %v2907_v52  ;;  %v806_v52 = vrot.slane %v3996_v62, 5  ;;  %v2928_v41 = vcombine.low %v765_v15, %v768_v48  ;;  %v2068_v36 = vshll.u32 %v4248_v30, 16  ;;  %v2055_v21 = vor.u32 %v2054_v53, %v2051_v16  ;;  %v4280_v8 = vld [vmem:[%s3767_s5 + $0x34] sm:$0xf] }
  0x69   : > { %v2065_v28 = vor.u32 %v2064_v19, %v4254_v11  ;;  %v2082_v40 = vshll.u32 %v4261_v14, 16  ;;  %v2086_v43 = vshrl.u32 %v4261_v14, 16  ;;  %v813_v15 = vrot.slane %v4034_v37, 5 }
  0x6a   : > { %v4265_v62 = vsel %vm3961_vm7, %v2925_v34, %v806_v52  ;;  %v808_v26 = vrot.slane %v806_v52, 4  ;;  %v2106_v48 = vshll.u32 %v4280_v8, 16  ;;  %v2110_v34 = vshrl.u32 %v4280_v8, 16 }
  0x6b   : > { %v816_v16 = vrot.slane %v4043_v54, 5  ;;  %v2056_v53 = vrot.slane %v2055_v21, 4  ;;  %v2070_v52 = vrot.slane %v2068_v36, 5  ;;  %v2066_v37 = vrot.slane %v2065_v28, 4  ;;  %v4303_v36 = vld [vmem:[%s3767_s5 + $0x2c] sm:$0x1] }
  0x6c   : > { %v4277_v24 = vsel %vm3961_vm7, %v808_v26, %v809_v39  ;;  %v4299_v26 = vrot.slane %v2082_v40, 5  ;;  %v4310_v21 = vld [vmem:[%s3767_s5 + $0x38] sm:$0x1]  ;;  %v1071_v28 = vsel %vm470_vm0, %v4141_v6, 0 }
  0x6d   : > { %3390 = vmatmul.mubr.msk.bf16.vlgmr.msra.gmra.mrb[0].mxu0 %vm445_vm3, %v3629_v57  ;;  %v2076_v57 = vshll.u32 %v3091_v61, 16  ;;  %v3635_v40 = vld [vmem:[%s3767_s5 + $0x54] sm:$0xff]  }
  0x6e   : > { %3406 = vmatpush3.bf16.msra.mxu0 %v2291_v18  ;;  %3393 = vmatprep.mubr.msk.bf16.mxu0 %vm445_vm3, %v3631_v4  ;;  %v2097_v18 = vshrl.u32 %v3094_v55, 16  ;;  %v2926_v4 = vrot.slane %v742_v44, 9 }
  0x6f   : > { %3308 = vmatmul.mubr.msk.bf16.gmra.mrb[8].mxu1 %vm445_vm3, %v2908_v22  ;;  %3580 = vmatprep.subr.msk.bf16.mxu0 %vm470_vm0, %v4240_v38  ;;  %v2073_v22 = vshrl.u32 %v3091_v61, 16  ;;  %v815_v61 = vrot.slane %v813_v15, 4  ;;  %v2078_v54 = vrot.slane %v2076_v57, 5  ;;  %v2112_v57 = vrot.slane %v2110_v34, 4  ;;  %v3100_v34 = vld [vmem:[%s3767_s5 + $0x48] sm:$0xf] }
  0x70   : > { %3311 = vmatprep.mubr.msk.bf16.mxu1 %vm445_vm3, %v2909_v56  ;;  %v2100_v56 = vshll.u32 %v3094_v55, 16  ;;  %v4295_v19 = vsel %vm3961_vm7, %v2926_v4, %v813_v15  ;;  %v2088_v55 = vrot.slane %v2086_v43, 4  ;;  %v2099_v44 = vrot.slane %v2097_v18, 4  ;;  %v4321_v43 = vld [vmem:[%s3767_s5 + $0x40] sm:$0xf] }
  0x71   : > { %v2075_v39 = vrot.slane %v2073_v22, 4  ;;  %v4312_v22 = vrot.slane %v2106_v48, 5  ;;  %v3636_v18 = vld [vmem:[%s3767_s5 + $0x60] sm:$0xff]   ;;  %v2071_v4 = vsel %vm3806_vm4, %v2066_v37, %v2070_v52  ;;  %v2092_v48 = vshll.u32 %v4303_v36, 16 }
  0x72   : > { %v2145_v52 = vshrl.u32 %v3100_v34, 16  ;;  %v2148_v37 = vshll.u32 %v3100_v34, 16 }
  0x73   : > { %v2079_v15 = vor.u32 %v2078_v54, %v2075_v39  ;;  %v2113_v63 = vor.u32 %v2112_v57, %v4312_v22  ;;  %v3103_v57 = vld [vmem:[%s3767_s5 + $0x54] sm:$0xf] }
  0x74   : > { %v2147_v50 = vrot.slane %v2145_v52, 4  ;;  %v2172_v34 = vshll.u32 %v3103_v57, 16 }
  0x75   : > { %3394 = vmatmul.mubr.msk.bf16.gmra.mrb[4].mxu0 %vm445_vm3, %v3633_v20  ;;  %v2102_v20 = vrot.slane %v2100_v56, 5  ;;  %v2061_v56 = vsel %vm3806_vm4, %v2056_v53, %v4254_v11  ;;  %v2130_v11 = vshll.u32 %v4321_v43, 16  ;;  %v2134_v53 = vshrl.u32 %v4321_v43, 16 }
  0x76   : > { %3397 = vmatprep.mubr.msk.bf16.mxu0 %vm445_vm3, %v3634_v1  ;;  %v2116_v1 = vshll.u32 %v4310_v21, 16  ;;  %v3113_v54 = vcombine.low %v2061_v56, %v2071_v4  ;;  %v2114_v56 = vrot.slane %v2113_v63, 4  ;;  %v4368_v63 = vld [vmem:[%s3767_s5 + $0x50] sm:$0x1] }
  0x77   : > { %3312 = vmatmul.mubr.msk.bf16.gmra.mrb[12].mxu1 %vm445_vm3, %v2910_v10  ;;  %v4307_v10 = vsel %vm3961_vm7, %v815_v61, %v816_v16  ;;  %v4332_v16 = vld [vmem:[%s3767_s5 + $0x4c] sm:$0xf]  ;;  %v2089_v61 = vor.u32 %v2088_v55, %v4299_v26  ;;  %v2103_v6 = vor.u32 %v2102_v20, %v2099_v44  ;;  %v2080_v55 = vrot.slane %v2079_v15, 4 }
  0x78   : > { %3317 = vmatprep.mubr.msk.bf16.mxu1 %vm445_vm3, %v2928_v41  ;;  %v3097_v41 = vld [vmem:[%s3767_s5 + $0x3c] sm:$0xf]  ;;  %v2154_v39 = vshll.u32 %v4332_v16, 16  ;;  %v2094_v44 = vrot.slane %v2092_v48, 5  ;;  %v2158_v20 = vshrl.u32 %v4332_v16, 16  ;;  %v2118_v33 = vrot.slane %v2116_v1, 5 }
  0x79   : > { %v2121_v49 = vshrl.u32 %v3097_v41, 16  ;;  %v2124_v13 = vshll.u32 %v3097_v41, 16  ;;  %v2090_v41 = vrot.slane %v2089_v61, 4  ;;  %v4356_v15 = vrot.slane %v2130_v11, 5 }
  0x7a   : > { %v2136_v48 = vrot.slane %v2134_v53, 4  ;;  %v2169_v1 = vshrl.u32 %v3103_v57, 16  ;;  %v1340_v11 = vshll.u32 %v4082_v59, 16  ;;  %v2085_v53 = vsel %vm3806_vm4, %v2080_v55, %v4299_v26 }
  0x7b   : > { %v2123_v25 = vrot.slane %v2121_v49, 4  ;;  %v2126_v4 = vrot.slane %v2124_v13, 5  ;;  %v4365_v49 = vrot.slane %v2154_v39, 5  ;;  %v2160_v13 = vrot.slane %v2158_v20, 4 }
  0x7c   : > { %v2095_v52 = vsel %vm3806_vm4, %v2090_v41, %v2094_v44  ;;  %v2137_v57 = vor.u32 %v2136_v48, %v4356_v15  ;;  %v2119_v26 = vsel %vm3806_vm4, %v2114_v56, %v2118_v33  ;;  %v2171_v44 = vrot.slane %v2169_v1, 4  ;;  %v4406_v56 = vld [vmem:[%s3767_s5 + $0x5c] sm:$0x1] }
  0x7d   : > { %3398 = vmatmul.mubr.msk.bf16.gmra.mrb[8].mxu0 %vm445_vm3, %v3635_v40  ;;  %v2104_v40 = vrot.slane %v2103_v6, 4  ;;  %v2127_v20 = vor.u32 %v2126_v4, %v2123_v25  ;;  %v2161_v41 = vor.u32 %v2160_v13, %v4365_v49  ;;  %v4696_v33 = vcombine.low %v4192_v2, %v4207_v9 }
  0x7e   : > { %3401 = vmatprep.mubr.msk.bf16.mxu0 %vm445_vm3, %v3636_v18  ;;  %v3637_v18 = vld [vmem:[%s3767_s5 + $0x6c] sm:$0xff]   ;;  %v2193_v4 = vshrl.u32 %v3106_v7, 16  ;;  %v1344_v48 = vshrl.u32 %v4082_v59, 16  ;;  %v3114_v13 = vcombine.low %v2085_v53, %v2095_v52 }
  0x7f   : > { %3318 = vmatmul.mubr.msk.bf16.vlgmr.msra.gmra.mrb[0].mxu1 %vm445_vm3, %v2929_v27  ;;  %v4353_v27 = vld [vmem:[%s3767_s5 + $0x58] sm:$0xf]  ;;  %v2109_v39 = vsel %vm3806_vm4, %v2104_v40, %v4312_v22  ;;  %v4695_v22 = vcombine.low %v4186_v58, %v4198_v23  ;;  %v2174_v40 = vrot.slane %v2172_v34, 5  ;;  %v2196_v58 = vshll.u32 %v3106_v7, 16 }
  0x80   : > { %3334 = vmatpush3.bf16.msra.mxu1 %v1071_v28  ;;  %3321 = vmatprep.mubr.msk.bf16.mxu1 %vm445_vm3, %v2930_v29  ;;  %v3646_v28 = vld [vmem:[%s4679_s1 + $0x8] sm:$0x3]  ;;  %v2150_v29 = vrot.slane %v2148_v37, 5  ;;  %v2178_v61 = vshll.u32 %v4353_v27, 16  ;;  %v2182_v6 = vshrl.u32 %v4353_v27, 16  ;;  %v2545_v37 = vsel %vm470_vm0, %v4240_v38, 0 }
  0x81   : > { %3576 = vmatprep.subr.msk.bf16.mxu1 %vm470_vm0, %v3646_v28  ;;  %v2140_v28 = vshll.u32 %v4363_v46, 16  ;;  %v2164_v38 = vshll.u32 %v4368_v63, 16  ;;  %v2202_v23 = vshll.u32 %v4387_v60, 16  ;;  %v3115_v34 = vcombine.low %v2109_v39, %v2119_v26 }
  0x82   : > { %v2151_v55 = vor.u32 %v2150_v29, %v2147_v50  ;;  %v4399_v25 = vrot.slane %v2178_v61, 5  ;;  %v2128_v50 = vrot.slane %v2127_v20, 4  ;;  %v2138_v29 = vrot.slane %v2137_v57, 4 }
  0x83   : > { %v2142_v1 = vrot.slane %v2140_v28, 5  ;;  %v2166_v9 = vrot.slane %v2164_v38, 5  ;;  %v2162_v61 = vrot.slane %v2161_v41, 4  ;;  %v2188_v7 = vshll.u32 %v4406_v56, 16  ;;  %v4427_v28 = vld [vmem:[%s3767_s5 + $0x68] sm:$0x1] }
  0x84   : > { %v2152_v2 = vrot.slane %v2151_v55, 4  ;;  %v2195_v35 = vrot.slane %v2193_v4, 4  ;;  %v4417_v59 = vrot.slane %v2202_v23, 5  ;;  %v4419_v57 = vrot.slane %v1340_v11, 5 }
  0x85   : > { %3402 = vmatmul.mubr.msk.bf16.gmra.mrb[12].mxu0 %vm445_vm3, %v3637_v18  ;;  %v2184_v18 = vrot.slane %v2182_v6, 4  ;;  %v2175_v6 = vor.u32 %v2174_v40, %v2171_v44  ;;  %v1346_v53 = vrot.slane %v1344_v48, 4  ;;  %v2133_v52 = vsel %vm3806_vm4, %v2128_v50, %v4356_v15 }
  0x86   : > { %3407 = vmatprep.mubr.msk.bf16.mxu0 %vm445_vm3, %v3113_v54  ;;  %v2206_v54 = vshrl.u32 %v4387_v60, 16  ;;  %v2198_v60 = vrot.slane %v2196_v58, 5  ;;  %v2143_v39 = vsel %vm3806_vm4, %v2138_v29, %v2142_v1  ;;  %v2226_v38 = vshll.u32 %v4415_v12, 16  ;;  %v3638_v1 = vld [vmem:[%s3767_s5 + $0xc] sm:$0xff]  }
  0x87   : > { %3322 = vmatmul.mubr.msk.bf16.gmra.mrb[4].mxu1 %vm445_vm3, %v4695_v22  ;;  %v2185_v22 = vor.u32 %v2184_v18, %v4399_v25  ;;  %v2230_v44 = vshrl.u32 %v4415_v12, 16  ;;  %v4697_v11 = vcombine.low %v4226_v47, %v4244_v51  ;;  %v2157_v15 = vsel %vm3806_vm4, %v2152_v2, %v4365_v49 }
  0x88   : > { %3325 = vmatprep.mubr.msk.bf16.mxu1 %vm445_vm3, %v4696_v33  ;;  %v3109_v33 = vld [vmem:[%s3767_s5 + $0x6c] sm:$0xf]  ;;  %v2208_v20 = vrot.slane %v2206_v54, 4  ;;  %v2167_v41 = vsel %vm3806_vm4, %v2162_v61, %v2166_v9  ;;  %v2176_v40 = vrot.slane %v2175_v6, 4  ;;  %v2190_v18 = vrot.slane %v2188_v7, 5 }
  0x89   : > { %v2217_v26 = vshrl.u32 %v3109_v33, 16  ;;  %v2220_v55 = vshll.u32 %v3109_v33, 16  ;;  %v4698_v4 = vcombine.low %v4265_v62, %v4277_v24  ;;  %v2186_v47 = vrot.slane %v2185_v22, 4  ;;  %v2994_v22 = vld [vmem:[%s3767_s5 + $0x48] sm:$0xf] }
  0x8a   : > { %v2199_v51 = vor.u32 %v2198_v60, %v2195_v35  ;;  %v2212_v49 = vshll.u32 %v4427_v28, 16  ;;  %v1347_v58 = vor.u32 %v1346_v53, %v4419_v57  ;;  %v1350_v23 = vshll.u32 %v4085_v0, 16  ;;  %v4456_v60 = vld [vmem:[%s3767_s5 + $0x74] sm:$0x1] }
  0x8b   : > { %v3116_v54 = vcombine.low %v2133_v52, %v2143_v39  ;;  %v2219_v48 = vrot.slane %v2217_v26, 4  ;;  %v2222_v62 = vrot.slane %v2220_v55, 5  ;;  %v4450_v24 = vrot.slane %v2226_v38, 5 }
  0x8c   : > { %v2232_v50 = vrot.slane %v2230_v44, 4  ;;  %v3117_v29 = vcombine.low %v2157_v15, %v2167_v41  ;;  %v2181_v35 = vsel %vm3806_vm4, %v2176_v40, %v4399_v25  ;;  %v2200_v0 = vrot.slane %v2199_v51, 4  ;;  %v3640_v51 = vld [vmem:[%s3767_s5 + $0x24] sm:$0xff]  }
  0x8d   : > { %3408 = vmatmul.mubr.msk.bf16.vlgmr.msra.gmra.mrb[0].mxu0 %vm445_vm3, %v3114_v13  ;;  %v2191_v13 = vsel %vm3806_vm4, %v2186_v47, %v2190_v18  ;;  %v2214_v2 = vrot.slane %v2212_v49, 5  ;;  %v1348_v9 = vrot.slane %v1347_v58, 4  ;;  %v1352_v61 = vrot.slane %v1350_v23, 5 }
  0x8e   : > { %3424 = vmatpush3.bf16.msra.mxu0 %v2545_v37  ;;  %3411 = vmatprep.mubr.msk.bf16.mxu0 %vm445_vm3, %v3115_v34  ;;  %v2209_v37 = vor.u32 %v2208_v20, %v4417_v59  ;;  %v2440_v6 = vrot.slane %v4214_v31, 5  ;;  %v2223_v7 = vor.u32 %v2222_v62, %v2219_v48  ;;  %v2233_v33 = vor.u32 %v2232_v50, %v4450_v24  ;;  %v3129_v20 = vld [vmem:[%s3767_s5 + $0x18] sm:$0xe]  ;;  %v3131_v62 = vld [vmem:[%s3767_s5 + $0x30] sm:$0xe] }
  0x8f   : > { %3326 = vmatmul.mubr.msk.bf16.gmra.mrb[8].mxu1 %vm445_vm3, %v4697_v11  ;;  %v2236_v25 = vshll.u32 %v4456_v60, 16  ;;  %v4699_v53 = vcombine.low %v4295_v19, %v4307_v10  ;;  %v3118_v52 = vcombine.low %v2181_v35, %v2191_v13  ;;  %v2205_v31 = vsel %vm3806_vm4, %v2200_v0, %v4417_v59  ;;  %v3639_v59 = vld [vmem:[%s3767_s5 + $0x18] sm:$0xff]  }
  0x90   : > { %3329 = vmatprep.mubr.msk.bf16.mxu1 %vm445_vm3, %v4698_v4  ;;  %v2210_v34 = vrot.slane %v2209_v37, 4  ;;  %v1331_v26 = vshrl.u32 %v2994_v22, 16  ;;  %v1334_v55 = vshll.u32 %v2994_v22, 16  ;;  %v3137_v19 = vrot.slane %v3129_v20, 9  ;;  %v2991_v4 = vld [vmem:[%s3767_s5 + $0x3c] sm:$0xf] }
  0x91   : > { %v2442_v10 = vrot.slane %v2440_v6, 4  ;;  %v2443_v38 = vrot.slane %v4248_v30, 5  ;;  %v1353_v44 = vsel %vm3806_vm4, %v1348_v9, %v1352_v61  ;;  %v2224_v11 = vrot.slane %v2223_v7, 4  ;;  %v3130_v30 = vld [vmem:[%s3767_s5 + $0x24] sm:$0xe]  ;;  %v3641_v22 = vld [vmem:[%s3767_s5 + $0x30] sm:$0xff]  }
  0x92   : > { %v2215_v39 = vsel %vm3806_vm4, %v2210_v34, %v2214_v2  ;;  %v2234_v15 = vrot.slane %v2233_v33, 4  ;;  %v2238_v41 = vrot.slane %v2236_v25, 5  ;;  %v1333_v40 = vrot.slane %v1331_v26, 4  ;;  %v3642_v20 = vld [vmem:[%s3767_s5 + $0x3c] sm:$0xff]   ;;  %v2997_v26 = vld [vmem:[%s3767_s5 + $0x54] sm:$0xf] }
  0x93   : > { %v3119_v18 = vcombine.low %v2205_v31, %v2215_v39  ;;  %v1336_v47 = vrot.slane %v1334_v55, 5  ;;  %v2441_v37 = vsel %vm3961_vm7, %v3137_v19, %v2440_v6  ;;  %v2444_v49 = vsel %vm3961_vm7, %v2442_v10, %v2443_v38  ;;  %v3133_v38 = vld [vmem:[%s3767_s5 + $0x48] sm:$0xe] }
  0x94   : > { %v2447_v58 = vrot.slane %v4261_v14, 5  ;;  %v2239_v48 = vsel %vm3806_vm4, %v2234_v15, %v2238_v41  ;;  %v2454_v50 = vrot.slane %v4280_v8, 5  ;;  %v1310_v35 = vshll.u32 %v2991_v4, 16 }
  0x95   : > { %3412 = vmatmul.mubr.msk.bf16.gmra.mrb[4].mxu0 %vm445_vm3, %v3116_v54  ;;  %v1337_v23 = vor.u32 %v1336_v47, %v1333_v40  ;;  %v2229_v54 = vsel %vm3806_vm4, %v2224_v11, %v4450_v24  ;;  %v1316_v14 = vshll.u32 %v4064_v42, 16  ;;  %v3138_v24 = vrot.slane %v3130_v30, 9 }
  0x96   : > { %3415 = vmatprep.mubr.msk.bf16.mxu0 %vm445_vm3, %v3117_v29  ;;  %v1307_v29 = vshrl.u32 %v2991_v4, 16  ;;  %v2450_v8 = vrot.slane %v4303_v36, 5  ;;  %v3146_v0 = vcombine.low %v2441_v37, %v2444_v49  ;;  %v2449_v34 = vrot.slane %v2447_v58, 4  ;;  %v3643_v37 = vld [vmem:[%s3767_s5 + $0x48] sm:$0xff]  }
  0x97   : > { %3330 = vmatmul.mubr.msk.bf16.gmra.mrb[12].mxu1 %vm445_vm3, %v4699_v53  ;;  %v1338_v13 = vrot.slane %v1337_v23, 4  ;;  %v3139_v2 = vrot.slane %v3131_v62, 9  ;;  %v3120_v61 = vcombine.low %v2229_v54, %v2239_v48  ;;  %v2456_v6 = vrot.slane %v2454_v50, 4  ;;  %v3644_v23 = vld [vmem:[%s3767_s5 + $0x54] sm:$0xff]  }
  0x98   : > { %3335 = vmatprep.mubr.msk.bf16.mxu1 %vm445_vm3, %v3638_v1  ;;  %v1320_v1 = vshrl.u32 %v4064_v42, 16  ;;  %v2457_v42 = vrot.slane %v4310_v21, 5  ;;  %v1309_v7 = vrot.slane %v1307_v29, 4  ;;  %v1312_v33 = vrot.slane %v1310_v35, 5 }
  0x99   : > { %v1343_v9 = vsel %vm3806_vm4, %v1338_v13, %v4419_v57  ;;  %v4512_v25 = vrot.slane %v1316_v14, 5  ;;  %v2448_v53 = vsel %vm3961_vm7, %v3138_v24, %v2447_v58  ;;  %v2451_v57 = vsel %vm3961_vm7, %v2449_v34, %v2450_v8  ;;  %v3134_v24 = vld [vmem:[%s3767_s5 + $0x54] sm:$0xe]  ;;  %v4700_v8 = vld [vmem:[#allocation5_spill] sm:$0xff] }
  0x9a   : > { %v1322_v36 = vrot.slane %v1320_v1, 4  ;;  %v2455_v21 = vsel %vm3961_vm7, %v3139_v2, %v2454_v50  ;;  %v2461_v31 = vrot.slane %v4321_v43, 5  ;;  %v1326_v39 = vshll.u32 %v4067_v45, 16  ;;  %v3000_v50 = vld [vmem:[%s3767_s5 + $0x60] sm:$0xf] }
  0x9b   : > { %v2458_v55 = vsel %vm3961_vm7, %v2456_v6, %v2457_v42  ;;  %v1313_v19 = vor.u32 %v1312_v33, %v1309_v7  ;;  %v3147_v43 = vcombine.low %v2448_v53, %v2451_v57  ;;  %v2464_v11 = vrot.slane %v4363_v46, 5  ;;  %v4702_v33 = vld [vmem:[#allocation2_spill] sm:$0xff] }
  0x9c   : > { %v1323_v10 = vor.u32 %v1322_v36, %v4512_v25  ;;  %v1355_v15 = vshrl.u32 %v2997_v26, 16  ;;  %v1358_v41 = vshll.u32 %v2997_v26, 16  ;;  %v1364_v40 = vshll.u32 %v4093_v17, 16 }
  0x9d   : > { %3416 = vmatmul.mubr.msk.bf16.gmra.mrb[8].mxu0 %vm445_vm3, %v3118_v52  ;;  %v3132_v52 = vld [vmem:[%s3767_s5 + $0x3c] sm:$0xe]  ;;  %v2463_v4 = vrot.slane %v2461_v31, 4  ;;  %v1328_v47 = vrot.slane %v1326_v39, 5  ;;  %v2471_v58 = vrot.slane %v4368_v63, 5  ;;  %v2475_v63 = vrot.slane %v4353_v27, 5 }
  0x9e   : > { %3419 = vmatprep.mubr.msk.bf16.mxu0 %vm445_vm3, %v3119_v18  ;;  %v3140_v45 = vrot.slane %v3132_v52, 9  ;;  %v3148_v18 = vcombine.low %v2455_v21, %v2458_v55  ;;  %v1324_v49 = vrot.slane %v1323_v10, 4  ;;  %v1357_v46 = vrot.slane %v1355_v15, 4  ;;  %v3135_v27 = vld [vmem:[%s3767_s5 + $0x60] sm:$0xe] }
  0x9f   : > { %3336 = vmatmul.mubr.msk.bf16.vlgmr.msra.gmra.mrb[0].mxu1 %vm445_vm3, %v3639_v59  ;;  %v1368_v59 = vshrl.u32 %v4093_v17, 16  ;;  %v1360_v54 = vrot.slane %v1358_v41, 5  ;;  %v1366_v48 = vrot.slane %v1364_v40, 5  ;;  %v2465_v29 = vsel %vm3961_vm7, %v2463_v4, %v2464_v11  ;;  %v3645_v52 = vld [vmem:[%s3767_s5 + $0x60] sm:$0xff]  }
  0xa0   : > { %3442 = vmatpush3.bf16.msra.mxu1 %v3749_v3  ;;  %3339 = vmatprep.mubr.msk.bf16.mxu1 %vm445_vm3, %v3640_v51  ;;  %v4509_v3 = vcombine.low %v1343_v9, %v1353_v44  ;;  %v2468_v44 = vrot.slane %v4332_v16, 5  ;;  %v3141_v51 = vrot.slane %v3133_v38, 9  ;;  %v1314_v16 = vrot.slane %v1313_v19, 4  ;;  %v4701_v9 = vld [vmem:[#allocation3_spill] sm:$0xff] }
  0xa1   : > { %v1370_v62 = vrot.slane %v1368_v59, 4  ;;  %v2462_v17 = vsel %vm3961_vm7, %v3140_v45, %v2461_v31  ;;  %v1329_v1 = vsel %vm3806_vm4, %v1324_v49, %v1328_v47  ;;  %v1379_v34 = vshrl.u32 %v3000_v50, 16  ;;  %v3136_v47 = vld [vmem:[%s3767_s5 + $0x6c] sm:$0xe] }
  0xa2   : > { %v2470_v30 = vrot.slane %v2468_v44, 4  ;;  %v2469_v35 = vsel %vm3961_vm7, %v3141_v51, %v2468_v44  ;;  %v1319_v14 = vsel %vm3806_vm4, %v1314_v16, %v4512_v25  ;;  %v1382_v2 = vshll.u32 %v3000_v50, 16 }
  0xa3   : > { %v1392_v6 = vshrl.u32 %v4701_v9, 16  ;;  %v3149_v42 = vcombine.low %v2462_v17, %v2465_v29  ;;  %v1371_v7 = vor.u32 %v1370_v62, %v1366_v48  ;;  %v1374_v25 = vshll.u32 %v4702_v33, 16 }
  0xa4   : > { %v2472_v13 = vsel %vm3961_vm7, %v2470_v30, %v2471_v58  ;;  %v2477_v53 = vrot.slane %v2475_v63, 4  ;;  %v2478_v57 = vrot.slane %v4406_v56, 5  ;;  %v3008_v21 = vcombine.low %v1319_v14, %v1329_v1 }
  0xa5   : > { %3420 = vmatmul.mubr.msk.bf16.gmra.mrb[12].mxu0 %vm445_vm3, %v3120_v61  ;;  %v1388_v61 = vshll.u32 %v4701_v9, 16  ;;  %v3150_v36 = vcombine.low %v2469_v35, %v2472_v13  ;;  %v3143_v31 = vrot.slane %v3135_v27, 9  ;;  %v2485_v26 = vrot.slane %v4427_v28, 5 }
  0xa6   : > { %3425 = vmatprep.mubr.msk.bf16.mxu0 %vm445_vm3, %v3146_v0  ;;  %v2482_v0 = vrot.slane %v4700_v8, 5  ;;  %v1381_v55 = vrot.slane %v1379_v34, 4  ;;  %v1384_v19 = vrot.slane %v1382_v2, 5  ;;  %v1394_v38 = vrot.slane %v1392_v6, 4 }
  0xa7   : > { %3340 = vmatmul.mubr.msk.bf16.gmra.mrb[4].mxu1 %vm445_vm3, %v3641_v22  ;;  %v1361_v22 = vor.u32 %v1360_v54, %v1357_v46  ;;  %v1390_v10 = vrot.slane %v1388_v61, 5  ;;  %v1376_v45 = vrot.slane %v1374_v25, 5  ;;  %v2479_v28 = vsel %vm3961_vm7, %v2477_v53, %v2478_v57 }
  0xa8   : > { %3343 = vmatprep.mubr.msk.bf16.mxu1 %vm445_vm3, %v3642_v20  ;;  %v3142_v20 = vrot.slane %v3134_v24, 9  ;;  %v2484_v39 = vrot.slane %v2482_v0, 4  ;;  %v2483_v11 = vsel %vm3961_vm7, %v3143_v31, %v2482_v0  ;;  %v2489_v15 = vrot.slane %v4415_v12, 5  ;;  %v4608_v0 = vld [vmem:[%s4680_s2] ss:$0 sm:$0xff] }
  0xa9   : > { %v1362_v44 = vrot.slane %v1361_v22, 4  ;;  %v1385_v40 = vor.u32 %v1384_v19, %v1381_v55  ;;  %v1395_v59 = vor.u32 %v1394_v38, %v1390_v10  ;;  %v3144_v30 = vrot.slane %v3136_v47, 9 }
  0xaa   : > { %v2476_v56 = vsel %vm3961_vm7, %v3142_v20, %v2475_v63  ;;  %v2486_v41 = vsel %vm3961_vm7, %v2484_v39, %v2485_v26  ;;  %v2491_v12 = vrot.slane %v2489_v15, 4  ;;  %v2492_v58 = vrot.slane %v4456_v60, 5 }
  0xab   : > { %v1367_v51 = vsel %vm3806_vm4, %v1362_v44, %v1366_v48  ;;  %v3151_v16 = vcombine.low %v2476_v56, %v2479_v28  ;;  %v3152_v49 = vcombine.low %v2483_v11, %v2486_v41  ;;  %v1386_v46 = vrot.slane %v1385_v40, 4 }
  0xac   : > { %v1396_v54 = vrot.slane %v1395_v59, 4  ;;  %v2490_v48 = vsel %vm3961_vm7, %v3144_v30, %v2489_v15  ;;  %v2493_v50 = vsel %vm3961_vm7, %v2491_v12, %v2492_v58 }
  0xad   : > { %3426 = vmatmul.mubr.msk.bf16.vlgmr.msra.gmra.mrb[0].mxu0 %vm445_vm3, %v3147_v43  ;;  %v1372_v43 = vrot.slane %v1371_v7, 4  ;;  %v1391_v60 = vsel %vm3806_vm4, %v1386_v46, %v1390_v10  ;;  %v3153_v29 = vcombine.low %v2490_v48, %v2493_v50 }
  0xae   : > { %3429 = vmatprep.mubr.msk.bf16.mxu0 %vm445_vm3, %v3148_v18  ;;  %v4703_v18 = vld [vmem:[#allocation4_spill] sm:$0xff] }
  0xaf   : > { %3344 = vmatmul.mubr.msk.bf16.gmra.mrb[8].mxu1 %vm445_vm3, %v3643_v37  ;;  %v1398_v4 = vshll.u32 %v4703_v18, 16  ;;  %v1377_v37 = vsel %vm3806_vm4, %v1372_v43, %v1376_v45 }
  0xb0   : > { %3347 = vmatprep.mubr.msk.bf16.mxu1 %vm445_vm3, %v3644_v23  ;;  %v3010_v23 = vcombine.low %v1367_v51, %v1377_v37 }
  0xb1   : > { %v1400_v62 = vrot.slane %v1398_v4, 5 }
  0xb3   : > { %v1401_v17 = vsel %vm3806_vm4, %v1396_v54, %v1400_v62 }
  0xb4   : > { %v3011_v35 = vcombine.low %v1391_v60, %v1401_v17 }
  0xb5   : > { %3430 = vmatmul.mubr.msk.bf16.gmra.mrb[4].mxu0 %vm445_vm3, %v3149_v42 }
  0xb6   : > { %3433 = vmatprep.mubr.msk.bf16.mxu0 %vm445_vm3, %v3150_v36 }
  0xb7   : > { %3348 = vmatmul.mubr.msk.bf16.gmra.mrb[12].mxu1 %vm445_vm3, %v3645_v52 }
  0xb8   : > { %3361 = vmatprep.mubr.msk.bf16.mxu1 %vm445_vm3, %v3008_v21 }
  0xbd   : > { %3434 = vmatmul.mubr.msk.bf16.gmra.mrb[8].mxu0 %vm445_vm3, %v3151_v16 }
  0xbe   : > { %3437 = vmatprep.mubr.msk.bf16.mxu0 %vm445_vm3, %v3152_v49 }
  0xbf   : > { %3362 = vmatmul.mubr.msk.bf16.vlgmr.msra.gmra.mrb[8].mxu1 %vm445_vm3, %v4509_v3 }
  0xc0   : > { %3365 = vmatprep.mubr.msk.bf16.mxu1 %vm445_vm3, %v3010_v23 }
  0xc5   : > { %3438 = vmatmul.mubr.msk.bf16.gmra.mrb[12].mxu0 %vm445_vm3, %v3153_v29 }
  0xc7   : > { %3366 = vmatmul.mubr.msk.bf16.gmra.mrb[12].mxu1 %vm445_vm3, %v3011_v35 }
 0x172   : > { %v3337_v3 = vpop.f32.mrb[0].mxu1 }
 0x173   : > { %v1107_v63 = vpop.f32.mrb[1].mxu1 }
 0x174   : > { %v3338_v14 = vpop.f32.mrb[2].mxu1 }
 0x175   : > { %v1110_v5 = vpop.f32.mrb[3].mxu1 }
 0x17a   : > { %v3341_v1 = vpop.f32.mrb[4].mxu1 }
 0x17b   : > { %v1123_v13 = vpop.f32.mrb[5].mxu1 }
 0x17c   : > { %v3342_v24 = vpop.f32.mrb[6].mxu1 }
 0x17d   : > { %v1126_v8 = vpop.f32.mrb[7].mxu1 }
 0x180   : > { %v3427_v32 = vpop.f32.mrb[0].mxu0 }
 0x181   : > { %v3443_v27 = vadd.f32 %v3427_v32, %v3337_v3  ;;  %v2581_v34 = vpop.f32.mrb[1].mxu0 }
 0x182   : > { %v3444_v2 = vadd.f32 %v2581_v34, %v1107_v63  ;;  %v3428_v9 = vpop.f32.mrb[2].mxu0 }
 0x183   : > { %v2669_v61 = vadd.f32 %v3443_v27, %v4608_v0  ;;  %v3445_v6 = vadd.f32 %v3428_v9, %v3338_v14  ;;  %v2584_v42 = vpop.f32.mrb[3].mxu0 }
 0x184   : > { %v2667_v22 = vadd.f32 %v3444_v2, %v4608_v0  ;;  %v3446_v7 = vadd.f32 %v2584_v42, %v1110_v5 }
 0x185   : > { %v2685_v33 = vmax.f32 %v2669_v61, 0.0  ;;  %v2670_v25 = vadd.f32 %v3445_v6, %v4608_v0 }
 0x186   : > { %v2683_v36 = vmax.f32 %v2667_v22, 0.0  ;;  %v2668_v20 = vadd.f32 %v3446_v7, %v4608_v0 }
 0x187   : > { %v3184_v53 = vpack.c.bf16 %v2685_v33, %v2685_v33  ;;  %v2686_v57 = vmax.f32 %v2670_v25, 0.0 }
 0x188   : > { %v3182_v52 = vpack.c.bf16 %v2683_v36, %v2683_v36  ;;  %v2684_v21 = vmax.f32 %v2668_v20, 0.0  ;;  %v3431_v31 = vpop.f32.mrb[4].mxu0 }
 0x189   : > { %2766 = vst.msk [vmem:[%s4616_s4 + $0x8] sm:$0xf] %vm2763_vm8, %v3184_v53  ;;  %v3185_v39 = vpack.c.bf16 %v2686_v57, %v2686_v57  ;;  %v3447_v26 = vadd.f32 %v3431_v31, %v3341_v1  ;;  %v2597_v55 = vpop.f32.mrb[5].mxu0 }
 0x18a   : > { %2764 = vst.msk [vmem:[%s4616_s4] sm:$0xf] %vm2763_vm8, %v3182_v52  ;;  %v3183_v19 = vpack.c.bf16 %v2684_v21, %v2684_v21  ;;  %v3448_v10 = vadd.f32 %v2597_v55, %v1123_v13  ;;  %v3432_v38 = vpop.f32.mrb[6].mxu0 }
 0x18b   : > { %2767 = vst.msk [vmem:[%s4616_s4 + $0xc] sm:$0xf] %vm2763_vm8, %v3185_v39  ;;  %v2673_v44 = vadd.f32 %v3447_v26, %v4608_v0  ;;  %v3449_v43 = vadd.f32 %v3432_v38, %v3342_v24  ;;  %v2600_v45 = vpop.f32.mrb[7].mxu0 }
 0x18c   : > { %2765 = vst.msk [vmem:[%s4616_s4 + $0x4] sm:$0xf] %vm2763_vm8, %v3183_v19  ;;  %v2671_v56 = vadd.f32 %v3448_v10, %v4608_v0  ;;  %v3450_v28 = vadd.f32 %v2600_v45, %v1126_v8 }
 0x18d   : > { %v2689_v11 = vmax.f32 %v2673_v44, 0.0  ;;  %v2674_v15 = vadd.f32 %v3449_v43, %v4608_v0 }
 0x18e   : > { %v2687_v41 = vmax.f32 %v2671_v56, 0.0  ;;  %v2672_v40 = vadd.f32 %v3450_v28, %v4608_v0 }
 0x18f   : > { %v3188_v59 = vpack.c.bf16 %v2689_v11, %v2689_v11  ;;  %v2690_v18 = vmax.f32 %v2674_v15, 0.0 }
 0x190   : > { %v3186_v4 = vpack.c.bf16 %v2687_v41, %v2687_v41  ;;  %v2688_v47 = vmax.f32 %v2672_v40, 0.0  ;;  %v3435_v51 = vpop.f32.mrb[8].mxu0 }
 0x191   : > { %2770 = vst.msk [vmem:[%s4616_s4 + $0x18] sm:$0xf] %vm2763_vm8, %v3188_v59  ;;  %v3189_v37 = vpack.c.bf16 %v2690_v18, %v2690_v18  ;;  %v2613_v49 = vpop.f32.mrb[9].mxu0 }
 0x192   : > { %v3363_v16 = vpop.f32.mrb[8].mxu1  ;;  %2768 = vst.msk [vmem:[%s4616_s4 + $0x10] sm:$0xf] %vm2763_vm8, %v3186_v4  ;;  %v3187_v30 = vpack.c.bf16 %v2688_v47, %v2688_v47  ;;  %v3436_v23 = vpop.f32.mrb[10].mxu0 }
 0x193   : > { %v3451_v12 = vadd.f32 %v3435_v51, %v3363_v16  ;;  %v1521_v58 = vpop.f32.mrb[9].mxu1  ;;  %2771 = vst.msk [vmem:[%s4616_s4 + $0x1c] sm:$0xf] %vm2763_vm8, %v3189_v37  ;;  %v2616_v62 = vpop.f32.mrb[11].mxu0 }
 0x194   : > { %v3452_v46 = vadd.f32 %v2613_v49, %v1521_v58  ;;  %v3364_v54 = vpop.f32.mrb[10].mxu1  ;;  %2769 = vst.msk [vmem:[%s4616_s4 + $0x14] sm:$0xf] %vm2763_vm8, %v3187_v30 }
 0x195   : > { %v2677_v48 = vadd.f32 %v3451_v12, %v4608_v0  ;;  %v3453_v50 = vadd.f32 %v3436_v23, %v3364_v54  ;;  %v1524_v60 = vpop.f32.mrb[11].mxu1 }
 0x196   : > { %v2675_v17 = vadd.f32 %v3452_v46, %v4608_v0  ;;  %v3454_v29 = vadd.f32 %v2616_v62, %v1524_v60 }
 0x197   : > { %v2693_v35 = vmax.f32 %v2677_v48, 0.0  ;;  %v2678_v3 = vadd.f32 %v3453_v50, %v4608_v0 }
 0x198   : > { %v2691_v63 = vmax.f32 %v2675_v17, 0.0  ;;  %v2676_v14 = vadd.f32 %v3454_v29, %v4608_v0  ;;  %v3439_v13 = vpop.f32.mrb[12].mxu0 }
 0x199   : > { %v3192_v5 = vpack.c.bf16 %v2693_v35, %v2693_v35  ;;  %v2694_v1 = vmax.f32 %v2678_v3, 0.0  ;;  %v2629_v27 = vpop.f32.mrb[13].mxu0 }
 0x19a   : > { %v3190_v24 = vpack.c.bf16 %v2691_v63, %v2691_v63  ;;  %v2692_v8 = vmax.f32 %v2676_v14, 0.0  ;;  %v3367_v32 = vpop.f32.mrb[12].mxu1  ;;  %v3440_v61 = vpop.f32.mrb[14].mxu0 }
 0x19b   : > { %2774 = vst.msk [vmem:[%s4616_s4 + $0x28] sm:$0xf] %vm2763_vm8, %v3192_v5  ;;  %v3193_v34 = vpack.c.bf16 %v2694_v1, %v2694_v1  ;;  %v3455_v2 = vadd.f32 %v3439_v13, %v3367_v32  ;;  %v1537_v9 = vpop.f32.mrb[13].mxu1  ;;  %v2632_v7 = vpop.f32.mrb[15].mxu0 }
 0x19c   : > { %2772 = vst.msk [vmem:[%s4616_s4 + $0x20] sm:$0xf] %vm2763_vm8, %v3190_v24  ;;  %v3191_v6 = vpack.c.bf16 %v2692_v8, %v2692_v8  ;;  %v3456_v42 = vadd.f32 %v2629_v27, %v1537_v9  ;;  %v3368_v22 = vpop.f32.mrb[14].mxu1 }
 0x19d   : > { %2775 = vst.msk [vmem:[%s4616_s4 + $0x2c] sm:$0xf] %vm2763_vm8, %v3193_v34  ;;  %v2681_v33 = vadd.f32 %v3455_v2, %v4608_v0  ;;  %v3457_v25 = vadd.f32 %v3440_v61, %v3368_v22  ;;  %v1540_v36 = vpop.f32.mrb[15].mxu1 }
 0x19e   : > { %2773 = vst.msk [vmem:[%s4616_s4 + $0x24] sm:$0xf] %vm2763_vm8, %v3191_v6  ;;  %v2679_v20 = vadd.f32 %v3456_v42, %v4608_v0  ;;  %v3458_v53 = vadd.f32 %v2632_v7, %v1540_v36 }
 0x19f   : > { %v2697_v57 = vmax.f32 %v2681_v33, 0.0  ;;  %v2682_v52 = vadd.f32 %v3457_v25, %v4608_v0 }
 0x1a0   : > { %v2695_v21 = vmax.f32 %v2679_v20, 0.0  ;;  %v2680_v31 = vadd.f32 %v3458_v53, %v4608_v0 }
 0x1a1   : > { %v3196_v39 = vpack.c.bf16 %v2697_v57, %v2697_v57  ;;  %v2698_v26 = vmax.f32 %v2682_v52, 0.0 }
 0x1a2   : > { %v3194_v55 = vpack.c.bf16 %v2695_v21, %v2695_v21  ;;  %v2696_v19 = vmax.f32 %v2680_v31, 0.0 }
 0x1a3   : > { %2778 = vst.msk [vmem:[%s4616_s4 + $0x38] sm:$0xf] %vm2763_vm8, %v3196_v39  ;;  %v3197_v10 = vpack.c.bf16 %v2698_v26, %v2698_v26 }
 0x1a4   : > { %2776 = vst.msk [vmem:[%s4616_s4 + $0x30] sm:$0xf] %vm2763_vm8, %v3194_v55  ;;  %v3195_v38 = vpack.c.bf16 %v2696_v19, %v2696_v19 }
 0x1a5   : > { %2779 = vst.msk [vmem:[%s4616_s4 + $0x3c] sm:$0xf] %vm2763_vm8, %v3197_v10 }
 0x1a6   : > { %2777 = vst.msk [vmem:[%s4616_s4 + $0x34] sm:$0xf] %vm2763_vm8, %v3195_v38 }
 0x1a7 PF: > { %s13_s16 = sadd.s32 1, %s3685_s16   ;;  %s4704_s12 = smov %s3677_s14 }
 0x1a8   : > { %p10_p7 = scmp.ge.s32.totalorder %s13_s16, 6   ;;  %s4705_s13 = smov %s3681_s15 }
 0x1a9   : > { %s4706_s14 = smov %s4709_s17  ;;  %s4707_s15 = smov %s4713_s18 }
 0x1aa   :  { %12 = sbr.rel (!%p10_p7) target bundleno = 3 (0x3), region = 73 }

</bundles_post_ra>
